<compile_context>
chip_gen: v7x
topology: tpu7x:2x2x1
jax: 0.10.0
libtpu: 0.0.40
codegen_flags: <defaults>
</compile_context>

<pallas_src>
import functools
import math

import jax
import jax.numpy as jnp
from jax.experimental import pallas as pl
from jax.experimental.pallas import tpu as pltpu


def _attn_kernel(x_ref, wq_ref, bq_ref, wk_ref, bk_ref, wv_ref, bv_ref,
                 wo_ref, bo_ref, out_ref, *, scale):
    h = pl.program_id(1)
    x = x_ref[0]                                                  # (N, D)

    # Per-head Q/K/V projection (this grid step's weight columns only).
    q = jnp.dot(x, wq_ref[...], preferred_element_type=jnp.float32) + bq_ref[...]
    k = jnp.dot(x, wk_ref[...], preferred_element_type=jnp.float32) + bk_ref[...]
    v = jnp.dot(x, wv_ref[...], preferred_element_type=jnp.float32) + bv_ref[...]

    # Fold the 1/sqrt(head_dim) scale into Q (N x hd) instead of S (N x N).
    q = q * scale
    s = jnp.dot(q, k.T, preferred_element_type=jnp.float32)      # (N, N)

    # Numerically stable softmax over keys.
    m = jnp.max(s, axis=-1, keepdims=True)
    p = jnp.exp(s - m)
    l = jnp.sum(p, axis=-1, keepdims=True)

    o = jnp.dot(p, v, preferred_element_type=jnp.float32)        # (N, hd)
    o = o * pl.reciprocal(l, approx=False)                       # normalize after P@V

    # This head's contribution to the output projection.
    contrib = jnp.dot(o, wo_ref[...], preferred_element_type=jnp.float32)

    # Output block is resident across the head axis -> accumulate in place.
    @pl.when(h == 0)
    def _():
        out_ref[0] = jnp.broadcast_to(bo_ref[...], out_ref.shape[1:]).astype(
            out_ref.dtype)

    out_ref[0] = out_ref[0] + contrib.astype(out_ref.dtype)


def attention(x, wq, bq, wk, bk, wv, bv, wo, bo, *, heads):
    """x: (B, N, D) f32.  W*: (D, inner) / (inner, D), b*: (inner,) / (D,)."""
    B, N, D = x.shape
    inner = wq.shape[1]
    head_dim = inner // heads
    scale = 1.0 / math.sqrt(head_dim)

    bq2 = bq.reshape(1, inner)
    bk2 = bk.reshape(1, inner)
    bv2 = bv.reshape(1, inner)
    bo2 = bo.reshape(1, D)

    kernel = functools.partial(_attn_kernel, scale=scale)

    return pl.pallas_call(
        kernel,
        out_shape=jax.ShapeDtypeStruct((B, N, D), x.dtype),
        grid_spec=pltpu.PrefetchScalarGridSpec(
            num_scalar_prefetch=0,
            grid=(B, heads),
            in_specs=[
                pl.BlockSpec((1, N, D), lambda b, h: (b, 0, 0)),        # x
                pl.BlockSpec((D, head_dim), lambda b, h: (0, h)),       # Wq cols
                pl.BlockSpec((1, head_dim), lambda b, h: (0, h)),       # bq
                pl.BlockSpec((D, head_dim), lambda b, h: (0, h)),       # Wk cols
                pl.BlockSpec((1, head_dim), lambda b, h: (0, h)),       # bk
                pl.BlockSpec((D, head_dim), lambda b, h: (0, h)),       # Wv cols
                pl.BlockSpec((1, head_dim), lambda b, h: (0, h)),       # bv
                pl.BlockSpec((head_dim, D), lambda b, h: (h, 0)),       # Wo rows
                pl.BlockSpec((1, D), lambda b, h: (0, 0)),              # bo
            ],
            out_specs=pl.BlockSpec((1, N, D), lambda b, h: (b, 0, 0)),
        ),
        compiler_params=pltpu.CompilerParams(
            dimension_semantics=("parallel", "arbitrary")),
    )(x, wq, bq2, wk, bk2, wv, bv2, wo, bo2)


def reference(x, wq, bq, wk, bk, wv, bv, wo, bo, *, heads):
    """Pure-JAX reference matching the PyTorch forward (mask=None, rope=None)."""
    B, N, D = x.shape
    inner = wq.shape[1]
    head_dim = inner // heads

    q = x @ wq + bq
    k = x @ wk + bk
    v = x @ wv + bv
    q = q.reshape(B, N, heads, head_dim).transpose(0, 2, 1, 3)
    k = k.reshape(B, N, heads, head_dim).transpose(0, 2, 1, 3)
    v = v.reshape(B, N, heads, head_dim).transpose(0, 2, 1, 3)

    s = jnp.einsum("bhqd,bhkd->bhqk", q, k) / math.sqrt(head_dim)
    p = jax.nn.softmax(s, axis=-1)
    o = jnp.einsum("bhqk,bhkd->bhqd", p, v)
    o = o.transpose(0, 2, 1, 3).reshape(B, N, inner)
    return o @ wo + bo


if __name__ == "__main__":
    key = jax.random.PRNGKey(0)
    ks = jax.random.split(key, 9)

    # Small, lane/sublane-aligned shapes consistent with the module:
    # Attention(dim=128, heads=2, dim_head=128) on x: (B=2, N=128, D=128).
    B, N, D = 2, 128, 128
    HEADS, HEAD_DIM = 2, 128
    INNER = HEADS * HEAD_DIM

    x = jax.random.normal(ks[0], (B, N, D), jnp.float32)
    wq = jax.random.normal(ks[1], (D, INNER), jnp.float32) * 0.05
    bq = jax.random.normal(ks[2], (INNER,), jnp.float32) * 0.05
    wk = jax.random.normal(ks[3], (D, INNER), jnp.float32) * 0.05
    bk = jax.random.normal(ks[4], (INNER,), jnp.float32) * 0.05
    wv = jax.random.normal(ks[5], (D, INNER), jnp.float32) * 0.05
    bv = jax.random.normal(ks[6], (INNER,), jnp.float32) * 0.05
    wo = jax.random.normal(ks[7], (INNER, D), jnp.float32) * 0.05
    bo = jax.random.normal(ks[8], (D,), jnp.float32) * 0.05

    out = attention(x, wq, bq, wk, bk, wv, bv, wo, bo, heads=HEADS)
    jax.block_until_ready(out)

    ref = reference(x, wq, bq, wk, bk, wv, bv, wo, bo, heads=HEADS)
    assert out.shape == (B, N, D)
    max_err = jnp.max(jnp.abs(out - ref))
    # Tolerance covers MXU f32-via-bf16-pass differences vs XLA's default dot.
    assert jnp.allclose(out, ref, atol=1e-2, rtol=1e-2), f"max abs err = {max_err}"
    print("KERNEL_OK")
</pallas_src>

<mosaic_0001>
module attributes {stable_mosaic.version = 11 : i64} {
  func.func @_attn_kernel(%arg0: i32, %arg1: i32, %arg2: memref<1x128x128xf32, #tpu.memory_space<vmem>>, %arg3: memref<128x128xf32, #tpu.memory_space<vmem>>, %arg4: memref<1x128xf32, #tpu.memory_space<vmem>>, %arg5: memref<128x128xf32, #tpu.memory_space<vmem>>, %arg6: memref<1x128xf32, #tpu.memory_space<vmem>>, %arg7: memref<128x128xf32, #tpu.memory_space<vmem>>, %arg8: memref<1x128xf32, #tpu.memory_space<vmem>>, %arg9: memref<128x128xf32, #tpu.memory_space<vmem>>, %arg10: memref<1x128xf32, #tpu.memory_space<vmem>>, %arg11: memref<1x128x128xf32, #tpu.memory_space<vmem>>) attributes {dimension_semantics = [#tpu.dimension_semantics<parallel>, #tpu.dimension_semantics<arbitrary>], iteration_bounds = array<i64: 2, 2>, scalar_prefetch = 0 : i64, scratch_operands = 0 : i64, tpu.core_type = #tpu.core_type<tc>, window_params = [{transform_indices = @transform_0, window_bounds = array<i64: 1, 128, 128>}, {transform_indices = @transform_1, window_bounds = array<i64: 128, 128>}, {transform_indices = @transform_2, window_bounds = array<i64: 1, 128>}, {transform_indices = @transform_3, window_bounds = array<i64: 128, 128>}, {transform_indices = @transform_4, window_bounds = array<i64: 1, 128>}, {transform_indices = @transform_5, window_bounds = array<i64: 128, 128>}, {transform_indices = @transform_6, window_bounds = array<i64: 1, 128>}, {transform_indices = @transform_7, window_bounds = array<i64: 128, 128>}, {pipeline_mode = #tpu.pipeline_mode<synchronous>, transform_indices = @transform_8, window_bounds = array<i64: 1, 128>}, {transform_indices = @transform_9, window_bounds = array<i64: 1, 128, 128>}]} {
    %c0 = arith.constant 0 : index
    %c0_0 = arith.constant 0 : index
    %c0_1 = arith.constant 0 : index
    %0 = vector.load %arg2[%c0, %c0_0, %c0_1] : memref<1x128x128xf32, #tpu.memory_space<vmem>>, vector<1x128x128xf32>
    %1 = vector.shape_cast %0 : vector<1x128x128xf32> to vector<128x128xf32>
    %c0_2 = arith.constant 0 : index
    %c0_3 = arith.constant 0 : index
    %2 = vector.load %arg3[%c0_2, %c0_3] : memref<128x128xf32, #tpu.memory_space<vmem>>, vector<128x128xf32>
    %cst = arith.constant dense<0.000000e+00> : vector<128x128xf32>
    %3 = tpu.matmul %1, %2, %cst {dimension_numbers = #tpu.dot_dimension_numbers<[1], [0], [0], [1], [0, 0, 1, 1], [], []>} : vector<128x128xf32>, vector<128x128xf32>, vector<128x128xf32> -> vector<128x128xf32>
    %c0_4 = arith.constant 0 : index
    %c0_5 = arith.constant 0 : index
    %4 = vector.load %arg4[%c0_4, %c0_5] : memref<1x128xf32, #tpu.memory_space<vmem>>, vector<1x128xf32>
    %5 = vector.broadcast %4 : vector<1x128xf32> to vector<128x128xf32>
    %6 = arith.addf %3, %5 : vector<128x128xf32>
    %c0_6 = arith.constant 0 : index
    %c0_7 = arith.constant 0 : index
    %7 = vector.load %arg5[%c0_6, %c0_7] : memref<128x128xf32, #tpu.memory_space<vmem>>, vector<128x128xf32>
    %cst_8 = arith.constant dense<0.000000e+00> : vector<128x128xf32>
    %8 = tpu.matmul %1, %7, %cst_8 {dimension_numbers = #tpu.dot_dimension_numbers<[1], [0], [0], [1], [0, 0, 1, 1], [], []>} : vector<128x128xf32>, vector<128x128xf32>, vector<128x128xf32> -> vector<128x128xf32>
    %c0_9 = arith.constant 0 : index
    %c0_10 = arith.constant 0 : index
    %9 = vector.load %arg6[%c0_9, %c0_10] : memref<1x128xf32, #tpu.memory_space<vmem>>, vector<1x128xf32>
    %10 = vector.broadcast %9 : vector<1x128xf32> to vector<128x128xf32>
    %11 = arith.addf %8, %10 : vector<128x128xf32>
    %c0_11 = arith.constant 0 : index
    %c0_12 = arith.constant 0 : index
    %12 = vector.load %arg7[%c0_11, %c0_12] : memref<128x128xf32, #tpu.memory_space<vmem>>, vector<128x128xf32>
    %cst_13 = arith.constant dense<0.000000e+00> : vector<128x128xf32>
    %13 = tpu.matmul %1, %12, %cst_13 {dimension_numbers = #tpu.dot_dimension_numbers<[1], [0], [0], [1], [0, 0, 1, 1], [], []>} : vector<128x128xf32>, vector<128x128xf32>, vector<128x128xf32> -> vector<128x128xf32>
    %c0_14 = arith.constant 0 : index
    %c0_15 = arith.constant 0 : index
    %14 = vector.load %arg8[%c0_14, %c0_15] : memref<1x128xf32, #tpu.memory_space<vmem>>, vector<1x128xf32>
    %15 = vector.broadcast %14 : vector<1x128xf32> to vector<128x128xf32>
    %16 = arith.addf %13, %15 : vector<128x128xf32>
    %cst_16 = arith.constant 0.0883883461 : f32
    %17 = vector.broadcast %cst_16 : f32 to vector<128x128xf32>
    %18 = arith.mulf %6, %17 : vector<128x128xf32>
    %19 = tpu.transpose %11, [1, 0] : vector<128x128xf32> -> vector<128x128xf32>
    %cst_17 = arith.constant dense<0.000000e+00> : vector<128x128xf32>
    %20 = tpu.matmul %18, %19, %cst_17 {dimension_numbers = #tpu.dot_dimension_numbers<[1], [0], [0], [1], [0, 0, 1, 1], [], []>} : vector<128x128xf32>, vector<128x128xf32>, vector<128x128xf32> -> vector<128x128xf32>
    %cst_18 = arith.constant dense<0xFF800000> : vector<128xf32>
    %21 = vector.multi_reduction <maximumf>, %20, %cst_18 [1] : vector<128x128xf32> to vector<128xf32>
    %22 = vector.shape_cast %21 : vector<128xf32> to vector<128x1xf32>
    %23 = vector.broadcast %22 : vector<128x1xf32> to vector<128x128xf32>
    %24 = arith.subf %20, %23 : vector<128x128xf32>
    %25 = math.exp %24 : vector<128x128xf32>
    %cst_19 = arith.constant dense<0.000000e+00> : vector<128xf32>
    %26 = vector.multi_reduction <add>, %25, %cst_19 [1] : vector<128x128xf32> to vector<128xf32>
    %27 = vector.shape_cast %26 : vector<128xf32> to vector<128x1xf32>
    %cst_20 = arith.constant dense<0.000000e+00> : vector<128x128xf32>
    %28 = tpu.matmul %25, %16, %cst_20 {dimension_numbers = #tpu.dot_dimension_numbers<[1], [0], [0], [1], [0, 0, 1, 1], [], []>} : vector<128x128xf32>, vector<128x128xf32>, vector<128x128xf32> -> vector<128x128xf32>
    %29 = tpu.reciprocal %27 : vector<128x1xf32> -> vector<128x1xf32>
    %30 = vector.broadcast %29 : vector<128x1xf32> to vector<128x128xf32>
    %31 = arith.mulf %28, %30 : vector<128x128xf32>
    %c0_21 = arith.constant 0 : index
    %c0_22 = arith.constant 0 : index
    %32 = vector.load %arg9[%c0_21, %c0_22] : memref<128x128xf32, #tpu.memory_space<vmem>>, vector<128x128xf32>
    %cst_23 = arith.constant dense<0.000000e+00> : vector<128x128xf32>
    %33 = tpu.matmul %31, %32, %cst_23 {dimension_numbers = #tpu.dot_dimension_numbers<[1], [0], [0], [1], [0, 0, 1, 1], [], []>} : vector<128x128xf32>, vector<128x128xf32>, vector<128x128xf32> -> vector<128x128xf32>
    %c0_i32 = arith.constant 0 : i32
    %34 = arith.cmpi eq, %arg1, %c0_i32 : i32
    %35 = arith.extui %34 : i1 to i32
    %c0_i32_24 = arith.constant 0 : i32
    %36 = arith.cmpi ne, %35, %c0_i32_24 : i32
    scf.if %36 {
      %c0_31 = arith.constant 0 : index
      %c0_32 = arith.constant 0 : index
      %43 = vector.load %arg10[%c0_31, %c0_32] : memref<1x128xf32, #tpu.memory_space<vmem>>, vector<1x128xf32>
      %44 = vector.shape_cast %43 : vector<1x128xf32> to vector<1x128xf32>
      %45 = vector.broadcast %44 : vector<1x128xf32> to vector<128x128xf32>
      %c0_33 = arith.constant 0 : index
      %c0_34 = arith.constant 0 : index
      %c0_35 = arith.constant 0 : index
      %46 = vector.load %arg11[%c0_33, %c0_34, %c0_35] : memref<1x128x128xf32, #tpu.memory_space<vmem>>, vector<1x128x128xf32>
      %47 = vector.shape_cast %46 : vector<1x128x128xf32> to vector<128x128xf32>
      %48 = vector.shape_cast %45 : vector<128x128xf32> to vector<1x128x128xf32>
      tpu.vector_store %arg11[%c0_33, %c0_34, %c0_35], %48 {strides = array<i32>} : memref<1x128x128xf32, #tpu.memory_space<vmem>>, vector<1x128x128xf32>,
    } else {
    }
    %c0_25 = arith.constant 0 : index
    %c0_26 = arith.constant 0 : index
    %c0_27 = arith.constant 0 : index
    %37 = vector.load %arg11[%c0_25, %c0_26, %c0_27] : memref<1x128x128xf32, #tpu.memory_space<vmem>>, vector<1x128x128xf32>
    %38 = vector.shape_cast %37 : vector<1x128x128xf32> to vector<128x128xf32>
    %39 = arith.addf %38, %33 : vector<128x128xf32>
    %c0_28 = arith.constant 0 : index
    %c0_29 = arith.constant 0 : index
    %c0_30 = arith.constant 0 : index
    %40 = vector.load %arg11[%c0_28, %c0_29, %c0_30] : memref<1x128x128xf32, #tpu.memory_space<vmem>>, vector<1x128x128xf32>
    %41 = vector.shape_cast %40 : vector<1x128x128xf32> to vector<128x128xf32>
    %42 = vector.shape_cast %39 : vector<128x128xf32> to vector<1x128x128xf32>
    tpu.vector_store %arg11[%c0_28, %c0_29, %c0_30], %42 {strides = array<i32>} : memref<1x128x128xf32, #tpu.memory_space<vmem>>, vector<1x128x128xf32>,
    return
  }
  func.func @transform_0(%arg0: i32, %arg1: i32) -> (i32, i32, i32) {
    %c0_i32 = arith.constant 0 : i32
    %c0_i32_0 = arith.constant 0 : i32
    %c0_i32_1 = arith.constant 0 : i32
    return %arg0, %c0_i32, %c0_i32_0 : i32, i32, i32
  }
  func.func @transform_1(%arg0: i32, %arg1: i32) -> (i32, i32) {
    %c0_i32 = arith.constant 0 : i32
    %c0_i32_0 = arith.constant 0 : i32
    return %c0_i32, %arg1 : i32, i32
  }
  func.func @transform_2(%arg0: i32, %arg1: i32) -> (i32, i32) {
    %c0_i32 = arith.constant 0 : i32
    %c0_i32_0 = arith.constant 0 : i32
    return %c0_i32, %arg1 : i32, i32
  }
  func.func @transform_3(%arg0: i32, %arg1: i32) -> (i32, i32) {
    %c0_i32 = arith.constant 0 : i32
    %c0_i32_0 = arith.constant 0 : i32
    return %c0_i32, %arg1 : i32, i32
  }
  func.func @transform_4(%arg0: i32, %arg1: i32) -> (i32, i32) {
    %c0_i32 = arith.constant 0 : i32
    %c0_i32_0 = arith.constant 0 : i32
    return %c0_i32, %arg1 : i32, i32
  }
  func.func @transform_5(%arg0: i32, %arg1: i32) -> (i32, i32) {
    %c0_i32 = arith.constant 0 : i32
    %c0_i32_0 = arith.constant 0 : i32
    return %c0_i32, %arg1 : i32, i32
  }
  func.func @transform_6(%arg0: i32, %arg1: i32) -> (i32, i32) {
    %c0_i32 = arith.constant 0 : i32
    %c0_i32_0 = arith.constant 0 : i32
    return %c0_i32, %arg1 : i32, i32
  }
  func.func @transform_7(%arg0: i32, %arg1: i32) -> (i32, i32) {
    %c0_i32 = arith.constant 0 : i32
    %c0_i32_0 = arith.constant 0 : i32
    return %arg1, %c0_i32 : i32, i32
  }
  func.func @transform_8(%arg0: i32, %arg1: i32) -> (i32, i32) {
    %c0_i32 = arith.constant 0 : i32
    %c0_i32_0 = arith.constant 0 : i32
    %c0_i32_1 = arith.constant 0 : i32
    return %c0_i32, %c0_i32_0 : i32, i32
  }
  func.func @transform_9(%arg0: i32, %arg1: i32) -> (i32, i32, i32) {
    %c0_i32 = arith.constant 0 : i32
    %c0_i32_0 = arith.constant 0 : i32
    %c0_i32_1 = arith.constant 0 : i32
    return %arg0, %c0_i32, %c0_i32_0 : i32, i32, i32
  }
}

</mosaic_0001>

<bundles_post_ra>
// kernel: tpu_custom_call.1
= control target key start
LH: loop header
LB: loop body
LE: loop exit
PB: predicated region body
PF: predicated region fallthrough
CT: control target
= control target key end

     0   :  { %s4089_s0 = inlined_call_operand.hbm [shape: f32[2,128,128], index: 0, kind: input, shape index: {}]   ;;  %s4090_s1 = inlined_call_operand.hbm [shape: f32[128,256], index: 1, kind: input, shape index: {}]   ;;  %s4091_s2 = inlined_call_operand.vmem [shape: f32[1,256], index: 2, kind: input, shape index: {}]   ;;  %s4092_s3 = inlined_call_operand.hbm [shape: f32[128,256], index: 3, kind: input, shape index: {}]   ;;  %s4093_s4 = inlined_call_operand.vmem [shape: f32[1,256], index: 4, kind: input, shape index: {}]   ;;  %s4094_s5 = inlined_call_operand.hbm [shape: f32[128,256], index: 5, kind: input, shape index: {}]   ;;  %s4095_s6 = inlined_call_operand.vmem [shape: f32[1,256], index: 6, kind: input, shape index: {}]   ;;  %s4096_s7 = inlined_call_operand.hbm [shape: f32[256,128], index: 7, kind: input, shape index: {}]   ;;  %s4097_s8 = inlined_call_operand.vmem [shape: f32[1,128], index: 8, kind: input, shape index: {}]   ;;  %s4098_s9 = inlined_call_operand.hbm [shape: f32[2,128,128], index: 9, kind: output, shape index: {}]  }
   0x1   :  { %4130 = sst [smem:[#allocation29_spill]] %s4090_s1 }
   0x2   :  { %4131 = sst [smem:[#allocation30_spill]] %s4091_s2 }
   0x3   :  { %4132 = sst [smem:[#allocation31_spill]] %s4093_s4 }
   0x4   :  { %4133 = sst [smem:[#allocation32_spill]] %s4094_s5 }
   0x5   :  { %4134 = sst [smem:[#allocation33_spill]] %s4095_s6 }
   0x6   :  { %4135 = sst [smem:[#allocation34_spill]] %s4096_s7 }
   0x7   :  { %4136 = sst [smem:[#allocation35_spill]] %s4097_s8 }
   0x8   :  { %4137 = sst [smem:[#allocation36_spill]] %s4098_s9 }
   0x9   :  { %14 = vsyncpa [#allocation3], 0 }
   0xa   :  { %16 = vsyncpa [#allocation3 + $0x1], 0 }
   0xb   :  { %17 = vsyncpa [#allocation6], 0 }
   0xc   :  { %19 = vsyncpa [#allocation6 + $0x1], 0 }
   0xd   :  { %20 = vsyncpa [#allocation9], 0 }
   0xe   :  { %22 = vsyncpa [#allocation9 + $0x1], 0 }
   0xf   :  { %23 = vsyncpa [#allocation4], 0 }
  0x10   :  { %25 = vsyncpa [#allocation4 + $0x1], 0  ;;  %s3280_s30 = smov 0   ;;  %s3282_s10 = smov 0  }
  0x11   :  { %s3284_s11 = smov 0   ;;  %s3286_s12 = smov 0  }
  0x12   :  { %s3288_s13 = smov 0   ;;  %s3290_s14 = smov 0  }
  0x13   :  { %s3292_s15 = smov 0   ;;  %s3294_s16 = smov 0  }
  0x14   :  { %s3296_s17 = smov 0   ;;  %s3298_s18 = smov 0  }
  0x15   :  { %s3300_s19 = smov 0  }
  0x16 LB: > { %4138 = sst [smem:[#allocation16_spill]] %s3181_s10  ;;  %p4102_p0 = scmp.eq.s32.totalorder %s3217_s19, 0  ;;  %s3217_s19 = sphi %s3300_s19, %s31_s19   ;;  %s3213_s18 = sphi %s3298_s18, %s4200_s18   ;;  %s3209_s17 = sphi %s3296_s17, %s4199_s17   ;;  %s3205_s16 = sphi %s3294_s16, %s4198_s16   ;;  %s3201_s15 = sphi %s3292_s15, %s4197_s15   ;;  %s3197_s14 = sphi %s3290_s14, %s4205_s14   ;;  %s3193_s13 = sphi %s3288_s13, %s4204_s13   ;;  %s3189_s12 = sphi %s3286_s12, %s4203_s12   ;;  %s3185_s11 = sphi %s3284_s11, %s4202_s11   ;;  %s3181_s10 = sphi %s3282_s10, %s4201_s10   ;;  %s3177_s30 = sphi %s3280_s30, %s4196_s30  }
  0x17   : > { %4139 = sst [smem:[#allocation17_spill]] %s3201_s15  ;;  %p83_p1 = scmp.ne.s32.totalorder %s3185_s11, %s3181_s10 }
  0x18   : > { %4140 = sst [smem:[#allocation18_spill]] %s3205_s16  ;;  %p4100_p4 = scmp.lt.s32.totalorder %s3217_s19, 4 }
  0x19   : > { %4141 = sst [smem:[#allocation19_spill]] %s3209_s17  ;;  %p85_p3 = por %p83_p1, %p4102_p0 }
  0x1a   : > { %4142 = sst [smem:[#allocation20_spill]] %s3213_s18  ;;  %s4101_s22 = sand.u32 1, %s3217_s19  }
  0x1b   : > { %s342_s23 = sand.u32 1, %s3185_s11   ;;  %s3350_s25 = sshll.u32 %s3209_s17, 7 }
  0x1c   : > { %s3347_s24 = sshll.u32 %s342_s23, 7  ;;  %s4143_s1 = sld [smem:[#allocation29_spill]] }
  0x1d   : > { %s344_s29 = scalar_lea.vmem [#allocation5], %s3347_s24  ;;  %p3363_p5 = pnand %p4100_p4, %p85_p3 }
  0x1e   : > { %s350_s21 = sshll.u32 %s344_s29, 4  ;;  %s3371_s26 = scalar_lea.sflag [#allocation6], %s4101_s22  ;;  %s3359_s21 = int_to_ptr.vmem [resolvable:$true] %s350_s21 }
  0x1f   : > { %s4144_s23 = scalar_select %p3363_p5, 1, 0 }
  0x20   : > { %p3377_p9 = pneg %p3363_p5 }
  0x22   : > { %s3356_s28 = scalar_lea.hbm %s4143_s1, %s3350_s25  ;;  %s2942_s16 = scalar_lea.hbm %s4143_s1, 4096 }
  0x23   : > { %s2937_s27 = scalar_lea.hbm %s3356_s28, 2048  ;;  %p2943_p12 = scmp.lt.u32.totalorder %s3356_s28, %s4143_s1 }
  0x24   : > { %p2938_p8 = scmp.ne.s32.totalorder %s3356_s28, %s2937_s27  ;;  %p2944_p13 = scmp.lt.u32.totalorder %s2942_s16, %s2937_s27 }
  0x25   : > { %p2946_p3 = scmp.lt.u32.totalorder %s2937_s27, %s3356_s28 }
  0x26   : > { %p2940_p10 = pnand %p3377_p9, %p2938_p8  ;;  %p2945_p1 = por %p2944_p13, %p2943_p12 }
  0x28   : > { %p2941_p11 = pneg %p2940_p10  ;;  %p2947_p4 = por %p2946_p3, %p2945_p1 }
  0x2a   : > { %p2948_p2 = pnand %p2947_p4, %p2941_p11 }
  0x2c   : > { %2951 = shalt.err (!%p2948_p2)
}
  0x2d   : > { %s2952_s22 = scalar_lea.vmem %s3359_s21, 2048  ;;  %s3219_s9 = smov [#allocation5]  }
  0x2e   : > { %p2953_p8 = scmp.ne.s32.totalorder %s3359_s21, %s2952_s22  ;;  %s2957_s29 = sshll.u32 %s3219_s9, 4  ;;  %s2958_s29 = int_to_ptr.vmem [resolvable:$false] %s2957_s29 }
  0x2f   : > { %s2959_s6 = scalar_lea.vmem %s2958_s29, 4096  ;;  %p2960_p6 = scmp.lt.s32.totalorder %s3359_s21, %s2958_s29 }
  0x30   : > { %p2955_p10 = pnand %p2953_p8, %p3377_p9  ;;  %p2961_p7 = scmp.lt.s32.totalorder %s2959_s6, %s2952_s22 }
  0x32   : > { %p2956_p0 = pneg %p2955_p10  ;;  %p2962_p12 = por %p2961_p7, %p2960_p6 }
  0x34   : > { %p2963_p13 = pnand %p2962_p12, %p2956_p0 }
  0x36   : > { %2966 = shalt.err (!%p2963_p13)
}
  0x37   : > { %s4103_s8 = smov 256   ;;  %s4105_s16 = smov 128  }
  0x38   : > { %s4107_s27 = smov 8   ;;  %p4146_p0 = scmp.lt.s32.totalorder %s3217_s19, 5 }
  0x39   : > { %2764 = dma.hbm_to_vmem [thread:$0]  (!%p3363_p5), %s3356_s28, 2048, %s3359_s21, %s3371_s26, %s4103_s8, %s4105_s16, %s4107_s27  }
  0x3a   : > { %p4147_p2 = scmp.ge.s32.totalorder %s3217_s19, 1  ;;  %s4150_s5 = sld [smem:[#allocation32_spill]] }
  0x3b   : > { %s396_s1 = scalar_lea.vmem [#allocation8], %s3347_s24  ;;  %s4151_s21 = sand.u32 1, %s3217_s19  }
  0x3c   : > { %p3408_p4 = pnand %p4147_p2, %p4146_p0  ;;  %s402_s2 = sshll.u32 %s396_s1, 4  ;;  %s3419_s2 = int_to_ptr.vmem [resolvable:$true] %s402_s2 }
  0x3d   : > { %s3423_s28 = scalar_lea.sflag [#allocation9], %s4151_s21 }
  0x3e   : > { %s4148_s22 = scalar_select %p3408_p4, 1, 0 }
  0x3f   : > { %4152 = sst [smem:[#allocation22_spill]] %s3423_s28 }
  0x40   : > { %4149 = sst [smem:[#allocation21_spill]] %s4148_s22  ;;  %s3416_s6 = scalar_lea.hbm %s4150_s5, %s3350_s25 }
  0x41   : > { %s2967_s8 = scalar_lea.hbm %s3416_s6, 2048  ;;  %s2972_s29 = scalar_lea.hbm %s4150_s5, 4096 }
  0x42   : > { %p2968_p6 = scmp.ne.s32.totalorder %s3416_s6, %s2967_s8  ;;  %p2973_p1 = scmp.lt.u32.totalorder %s3416_s6, %s4150_s5 }
  0x43   : > { %p2974_p3 = scmp.lt.u32.totalorder %s2972_s29, %s2967_s8  ;;  %p2976_p10 = scmp.lt.u32.totalorder %s2967_s8, %s3416_s6 }
  0x44   : > { %p2970_p7 = pnand %p2968_p6, %p3377_p9 }
  0x45   : > { %p2975_p8 = por %p2974_p3, %p2973_p1 }
  0x46   : > { %p2971_p11 = pneg %p2970_p7 }
  0x47   : > { %p2977_p12 = por %p2976_p10, %p2975_p8 }
  0x49   : > { %p2978_p13 = pnand %p2977_p12, %p2971_p11 }
  0x4b   : > { %2981 = shalt.err (!%p2978_p13)
}
  0x4c   : > { %s2982_s1 = scalar_lea.vmem %s3419_s2, 2048  ;;  %s3223_s16 = smov [#allocation8]  }
  0x4d   : > { %p2983_p0 = scmp.ne.s32.totalorder %s3419_s2, %s2982_s1  ;;  %s2987_s21 = sshll.u32 %s3223_s16, 4  ;;  %s2988_s21 = int_to_ptr.vmem [resolvable:$false] %s2987_s21 }
  0x4e   : > { %s2989_s4 = scalar_lea.vmem %s2988_s21, 4096  ;;  %p2990_p7 = scmp.lt.s32.totalorder %s3419_s2, %s2988_s21 }
  0x4f   : > { %p2985_p2 = pnand %p2983_p0, %p3377_p9  ;;  %p2991_p4 = scmp.lt.s32.totalorder %s2989_s4, %s2982_s1 }
  0x51   : > { %p2986_p6 = pneg %p2985_p2  ;;  %p2992_p1 = por %p2991_p4, %p2990_p7 }
  0x53   : > { %p2993_p3 = pnand %p2992_p1, %p2986_p6 }
  0x55   : > { %2996 = shalt.err (!%p2993_p3)
}
  0x56   : > { %s4153_s8 = smov 8   ;;  %s4154_s27 = smov 128  }
  0x57   : > { %s4155_s9 = smov 256   ;;  %s3451_s29 = sadd.s32 4294967295, %s3217_s19  }
  0x58   : > { %2770 = dma.hbm_to_vmem [thread:$0]  (!%p3363_p5), %s3416_s6, 2048, %s3419_s2, %s3423_s28, %s4155_s9, %s4154_s27, %s4153_s8  }
  0x59   : > { %4156 = sst [smem:[#allocation23_spill]] %s3451_s29  ;;  %s1975_s1 = sadd.s32 4294967294, %s3217_s19  }
  0x5a   : > { %s4157_s16 = sadd.s32 1, %s3209_s17  ;;  %s43_s21 = sadd.s32 1, %s3213_s18 }
  0x5b   : > { %p41_p4 = scmp.ge.s32.totalorder %s4157_s16, 2  ;;  %s50_s4 = sadd.s32 1, %s3197_s14 }
  0x5c   : > { %p57_p11 = scmp.ne.s32.totalorder %s3197_s14, %s3193_s13  ;;  %s4158_s5 = smov %s4157_s16 }
  0x5d   : > { %s4207_s5 = smov (%p41_p4, %s4158_s5), 0  ;;  %s4209_s21 = smov (!%p41_p4, %s43_s21), %s3213_s18 }
  0x5e   : > { %4159 = sst [smem:[#allocation24_spill]] %s4207_s5  ;;  %p4160_p8 = scmp.eq.s32.totalorder %s3217_s19, 0 }
  0x5f   : > { %p63_p12 = scmp.ne.s32.totalorder %s3193_s13, %s3189_s12  ;;  %p45_p13 = scmp.ge.s32.totalorder %s4209_s21, 2 }
  0x60   : > { %p3470_p10 = por %p4160_p8, %p57_p11  ;;  %p64_p0 = scmp.eq.s32.totalorder %s3451_s29, 0 }
  0x61   : > { %s73_s6 = ssub.s32 %s3209_s17, %s4207_s5  ;;  %p290_p2 = scmp.eq.s32.totalorder %s3451_s29, 3 }
  0x62   : > { %s4211_s21 = smov (%p45_p13, %s4209_s21), 0  ;;  %p3485_p6 = por %p64_p0, %p63_p12 }
  0x63   : > { %4162 = sst [smem:[#allocation25_spill]] %s4211_s21  ;;  %p74_p7 = scmp.eq.s32.totalorder %s73_s6, 0 }
  0x64   : > { %s4163_s16 = scalar_select %p3485_p6, 1, 0 }
  0x65   : > { %s47_s15 = ssub.s32 %s3213_s18, %s4211_s21  ;;  %p4165_p1 = scmp.ne.s32.totalorder %s3181_s10, %s3177_s30 }
  0x66   : > { %4164 = sst [smem:[#allocation26_spill]] %s4163_s16  ;;  %p48_p4 = scmp.eq.s32.totalorder %s47_s15, 0 }
  0x67   : > { %p3494_p3 = por %p4165_p1, %p64_p0  ;;  %p3501_p8 = por %p290_p2, %p57_p11 }
  0x68   : > { %s4170_s29 = sadd.s32 1, %s3185_s11  ;;  %p296_p13 = scmp.eq.s32.totalorder %s1975_s1, 3 }
  0x69   : > { %s4166_s22 = scalar_select %p3494_p3, 1, 0 }
  0x6a   : > { %s4168_s5 = scalar_select %p3501_p8, 1, 0 }
  0x6b   : > { %4167 = sst [smem:[#allocation27_spill]] %s4166_s22  ;;  %s319_s21 = sand.u32 1, %s3197_s14  }
  0x6c   : > { %4169 = sst [smem:[#allocation28_spill]] %s4168_s5  ;;  %s1978_s30 = sshll.u32 %s319_s21, 7 }
  0x6d   : > { %s3508_s28 = scalar_select %p74_p7, %s3185_s11, %s4170_s29  }
  0x6e   : > { %s3511_s6 = scalar_select %p48_p4, %s3197_s14, %s50_s4  }
  0x6f   : > { %p3517_p0 = por %p296_p13, %p63_p12  ;;  %s2007_s22 = sshll.u32 %s3213_s18, 11 }
  0x70   : > { %s323_s15 = scalar_lea.vmem [#allocation2], %s1978_s30  ;;  %s3525_s5 = scalar_lea.hbm %s4089_s0, %s2007_s22 }
  0x71   : > { %s4171_s10 = scalar_select %p3517_p0, 1, 0 }
  0x72   : > { %s330_s16 = sshll.u32 %s323_s15, 4  ;;  %p4172_p11 = scmp.lt.s32.totalorder %s3217_s19, 4  ;;  %s3527_s16 = int_to_ptr.vmem [resolvable:$true] %s330_s16 }
  0x73   : > { %s3541_s7 = scalar_lea.hbm %s4092_s3, %s3350_s25  ;;  %s370_s17 = scalar_lea.vmem [#allocation7], %s3347_s24 }
  0x74   : > { %p3533_p12 = pnand %p4172_p11, %p3470_p10  ;;  %s376_s22 = sshll.u32 %s370_s17, 4  ;;  %s3544_s22 = int_to_ptr.vmem [resolvable:$true] %s376_s22 }
  0x75   : > { %s3546_s30 = scalar_lea.sflag [#allocation3], %s319_s21  ;;  %s2997_s2 = scalar_lea.hbm %s3525_s5, 2048 }
  0x76   : > { %p2998_p2 = scmp.ne.s32.totalorder %s3525_s5, %s2997_s2  ;;  %p2999_p10 = pneg %p3533_p12 }
  0x77   : > { %s3002_s4 = scalar_lea.hbm %s4089_s0, 4096  ;;  %p3003_p4 = scmp.lt.u32.totalorder %s3525_s5, %s4089_s0 }
  0x78   : > { %p3000_p7 = pnand %p2999_p10, %p2998_p2  ;;  %p3004_p13 = scmp.lt.u32.totalorder %s3002_s4, %s2997_s2 }
  0x79   : > { %p3006_p0 = scmp.lt.u32.totalorder %s2997_s2, %s3525_s5 }
  0x7a   : > { %p3001_p1 = pneg %p3000_p7  ;;  %p3005_p11 = por %p3004_p13, %p3003_p4 }
  0x7c   : > { %p3007_p8 = por %p3006_p0, %p3005_p11 }
  0x7e   : > { %p3008_p3 = pnand %p3007_p8, %p3001_p1 }
  0x80   : > { %3011 = shalt.err (!%p3008_p3)
}
  0x81   : > { %s3012_s21 = scalar_lea.vmem %s3527_s16, 2048  ;;  %s3224_s17 = smov [#allocation2]  }
  0x82   : > { %p3013_p2 = scmp.ne.s32.totalorder %s3527_s16, %s3012_s21  ;;  %s3017_s15 = sshll.u32 %s3224_s17, 4  ;;  %s3018_s15 = int_to_ptr.vmem [resolvable:$false] %s3017_s15 }
  0x83   : > { %s3019_s18 = scalar_lea.vmem %s3018_s15, 4096  ;;  %p3020_p5 = scmp.lt.s32.totalorder %s3527_s16, %s3018_s15 }
  0x84   : > { %p3015_p7 = pnand %p3013_p2, %p2999_p10  ;;  %p3021_p4 = scmp.lt.s32.totalorder %s3019_s18, %s3012_s21 }
  0x86   : > { %p3016_p6 = pneg %p3015_p7  ;;  %p3022_p13 = por %p3021_p4, %p3020_p5 }
  0x88   : > { %p3023_p0 = pnand %p3022_p13, %p3016_p6 }
  0x8a   : > { %3026 = shalt.err (!%p3023_p0)
}
  0x8b   : > { %2761 = dma.hbm_to_vmem [thread:$0]  (!%p3533_p12), %s3525_s5, 2048, %s3527_s16, %s3546_s30, %s4154_s27, %s4154_s27, %s4153_s8  }
  0x8c   : > { %s3027_s2 = scalar_lea.hbm %s3541_s7, 2048  ;;  %s3032_s29 = scalar_lea.hbm %s4092_s3, 4096 }
  0x8d   : > { %p3028_p3 = scmp.ne.s32.totalorder %s3541_s7, %s3027_s2  ;;  %p3033_p8 = scmp.lt.u32.totalorder %s3541_s7, %s4092_s3 }
  0x8e   : > { %p3034_p10 = scmp.lt.u32.totalorder %s3032_s29, %s3027_s2  ;;  %p3036_p11 = scmp.lt.u32.totalorder %s3027_s2, %s3541_s7 }
  0x8f   : > { %p3030_p5 = pnand %p3028_p3, %p3377_p9 }
  0x90   : > { %p3035_p1 = por %p3034_p10, %p3033_p8 }
  0x91   : > { %p3031_p6 = pneg %p3030_p5 }
  0x92   : > { %p3037_p2 = por %p3036_p11, %p3035_p1 }
  0x94   : > { %p3038_p7 = pnand %p3037_p2, %p3031_p6 }
  0x96   : > { %3041 = shalt.err (!%p3038_p7)
}
  0x97   : > { %s3042_s5 = scalar_lea.vmem %s3544_s22, 2048  ;;  %s3225_s16 = smov [#allocation7]  }
  0x98   : > { %p3043_p12 = scmp.ne.s32.totalorder %s3544_s22, %s3042_s5  ;;  %s3047_s30 = sshll.u32 %s3225_s16, 4  ;;  %s3048_s30 = int_to_ptr.vmem [resolvable:$false] %s3047_s30 }
  0x99   : > { %s3049_s17 = scalar_lea.vmem %s3048_s30, 4096  ;;  %p3050_p0 = scmp.lt.s32.totalorder %s3544_s22, %s3048_s30 }
  0x9a   : > { %p3045_p4 = pnand %p3043_p12, %p3377_p9  ;;  %p3051_p3 = scmp.lt.s32.totalorder %s3049_s17, %s3042_s5 }
  0x9c   : > { %p3046_p13 = pneg %p3045_p4  ;;  %p3052_p5 = por %p3051_p3, %p3050_p0 }
  0x9e   : > { %p3053_p8 = pnand %p3052_p5, %p3046_p13 }
  0xa0   : > { %3056 = shalt.err (!%p3053_p8)
}
  0xa1   : > { %p4174_p6 = scmp.ne.s32.totalorder %s4144_s23, 0  ;;  %s4175_s15 = sld [smem:[#allocation19_spill]] }
  0xa2   : > { %s4176_s4 = sld [smem:[#allocation34_spill]]  ;;  %s422_s25 = scalar_lea.vmem [#allocation10], %s3347_s24 }
  0xa3   : > { %2767 = dma.hbm_to_vmem [thread:$0]  (!%p4174_p6), %s3541_s7, 2048, %s3544_s22, %s3371_s26, %s4155_s9, %s4154_s27, %s4153_s8  }
  0xa4   : > { %s429_s21 = sshll.u32 %s422_s25, 4  ;;  %s3609_s21 = int_to_ptr.vmem [resolvable:$true] %s429_s21 }
  0xa7   : > { %s2008_s18 = sshll.u32 %s4175_s15, 11 }
  0xa8   : > { %s3606_s29 = scalar_lea.hbm %s4176_s4, %s2008_s18  ;;  %s3062_s7 = scalar_lea.hbm %s4176_s4, 4096 }
  0xa9   : > { %s3057_s5 = scalar_lea.hbm %s3606_s29, 2048  ;;  %p3063_p2 = scmp.lt.u32.totalorder %s3606_s29, %s4176_s4 }
  0xaa   : > { %p3058_p10 = scmp.ne.s32.totalorder %s3606_s29, %s3057_s5  ;;  %p3064_p7 = scmp.lt.u32.totalorder %s3062_s7, %s3057_s5 }
  0xab   : > { %p3066_p4 = scmp.lt.u32.totalorder %s3057_s5, %s3606_s29 }
  0xac   : > { %p3060_p1 = pnand %p3058_p10, %p3377_p9  ;;  %p3065_p12 = por %p3064_p7, %p3063_p2 }
  0xae   : > { %p3061_p11 = pneg %p3060_p1  ;;  %p3067_p13 = por %p3066_p4, %p3065_p12 }
  0xb0   : > { %p3068_p0 = pnand %p3067_p13, %p3061_p11 }
  0xb2   : > { %3071 = shalt.err (!%p3068_p0)
}
  0xb3   : > { %s3072_s24 = scalar_lea.vmem %s3609_s21, 2048  ;;  %s3226_s30 = smov [#allocation10]  }
  0xb4   : > { %p3073_p3 = scmp.ne.s32.totalorder %s3609_s21, %s3072_s24  ;;  %s3077_s17 = sshll.u32 %s3226_s30, 4  ;;  %s3078_s17 = int_to_ptr.vmem [resolvable:$false] %s3077_s17 }
  0xb5   : > { %s3079_s15 = scalar_lea.vmem %s3078_s17, 4096  ;;  %p3080_p10 = scmp.lt.s32.totalorder %s3609_s21, %s3078_s17 }
  0xb6   : > { %p3075_p5 = pnand %p3073_p3, %p3377_p9  ;;  %p3081_p1 = scmp.lt.s32.totalorder %s3079_s15, %s3072_s24 }
  0xb8   : > { %p3076_p8 = pneg %p3075_p5  ;;  %p3082_p2 = por %p3081_p1, %p3080_p10 }
  0xba   : > { %p3083_p7 = pnand %p3082_p2, %p3076_p8 }
  0xbc   : > { %3086 = shalt.err (!%p3083_p7)
}
  0xbd   : > { %s4177_s18 = sld [smem:[#allocation22_spill]]  ;;  %s4178_s20 = sld [smem:[#allocation21_spill]] }
  0xc3   : > { %2773 = dma.hbm_to_vmem [thread:$0]  (!%p4174_p6), %s3606_s29, 2048, %s3609_s21, %s4177_s18, %s4154_s27, %s4154_s27, %s4153_s8  }
  0xc4   : > { %p4179_p9 = scmp.ne.s32.totalorder %s4178_s20, 0 }
  0xc5   : > { %s4180_s2 = sld [smem:[#allocation26_spill]] (!%p4179_p9)  ;;  %s3639_s1 = sand.u32 (!%p4179_p9), 1, %s3193_s13  }
  0xc6   : > { %441 = sbr.rel (%p4179_p9) target bundleno = 1396 (0x574), region = 56  ;;  %s1991_s25 = sshll.u32 (!%p4179_p9), %s3639_s1, 7 }
  0xc7   : > { %s444_s5 = scalar_lea.sflag (!%p4179_p9), [#allocation3], %s3639_s1  ;;  %s3645_s23 = scalar_lea.vmem (!%p4179_p9), [#allocation2], %s1991_s25 }
  0xcb   : > { %p4181_p11 = scmp.ne.s32.totalorder (!%p4179_p9), %s4180_s2, 0 }
  0xcd   : > { %3160 = dma.done.wait (%p4181_p11), %s444_s5, 2048  }
  0xce   : > { %3162 = vsyncadd (%p4181_p11), %s444_s5, 4294965248  ;;  %s4182_s8 = sld [smem:[#allocation23_spill]]  ;;  %s4183_s27 = sld [smem:[#allocation16_spill]] }
  0xcf   : > { %s4184_s29 = sld [smem:[#allocation27_spill]] }
  0xd4   : > { %s452_s21 = sand.u32 1, %s4182_s8   ;;  %s454_s26 = sand.u32 1, %s4183_s27  }
  0xd5   : > { %s3653_s9 = sshll.u32 %s454_s26, 7  ;;  %s453_s7 = scalar_lea.sflag [#allocation6], %s452_s21 }
  0xd6   : > { %s3656_s22 = scalar_lea.vmem [#allocation5], %s3653_s9  ;;  %p4185_p6 = scmp.ne.s32.totalorder %s4184_s29, 0 }
  0xd8   : > { %3164 = dma.done.wait (%p4185_p6), %s453_s7, 4096  }
  0xd9   : > { %3166 = vsyncadd (%p4185_p6), %s453_s7, 4294963200  ;;  %s3663_s16 = scalar_lea.vmem [#allocation7], %s3653_s9  ;;  %s471_s24 = scalar_lea.sflag [#allocation9], %s452_s21 }
  0xda   : > { %s3666_s30 = scalar_lea.vmem [#allocation8], %s3653_s9 }
  0xdb   : > { %3168 = dma.done.wait (%p4185_p6), %s471_s24, 4096  }
  0xdc   : > { %3170 = vsyncadd (%p4185_p6), %s471_s24, 4294963200  ;;  %v741_v0 = vld [vmem:[%s3663_s16] sm:$0xff]  ;;  %v742_v1 = vld [vmem:[%s3663_s16 + $0x8] sm:$0xff]  ;;  %s4186_s17 = sld [smem:[#allocation17_spill]]  ;;  %s4187_s2 = sld [smem:[#allocation31_spill]] }
  0xdd   : > { %v743_v2 = vld [vmem:[%s3663_s16 + $0x10] sm:$0xff]  ;;  %v2570_v3 = vpack.c.bf16 %v742_v1, %v741_v0  ;;  %v744_v4 = vld [vmem:[%s3663_s16 + $0x18] sm:$0xff]  ;;  %v745_v6 = vld [vmem:[%s3663_s16 + $0x20] sm:$0xff]  ;;  %s4188_s27 = sld [smem:[#allocation30_spill]]  ;;  %s4189_s7 = sld [smem:[#allocation33_spill]] }
  0xde   : > { %v2574_v5 = vpack.c.bf16 %v744_v4, %v743_v2  ;;  %v746_v7 = vld [vmem:[%s3663_s16 + $0x28] sm:$0xff]  ;;  %v3679_v9 = vld [vmem:[%s3645_s23] sm:$0xff]  ;;  %v747_v10 = vld [vmem:[%s3663_s16 + $0x30] sm:$0xff] }
  0xdf   : > { %2571 = vmatprep.subr.bf16.mxu1 %v2570_v3  ;;  %v2578_v8 = vpack.c.bf16 %v746_v7, %v745_v6  ;;  %v748_v11 = vld [vmem:[%s3663_s16 + $0x38] sm:$0xff]  ;;  %2290 = vmatprep.mubr.f32.mxu1 %v3679_v9  ;;  %v573_v12 = vld [vmem:[%s3656_s22] sm:$0xff]  ;;  %v574_v13 = vld [vmem:[%s3656_s22 + $0x8] sm:$0xff] }
  0xe0   : > { %2573 = vmatpush3.bf16.msra.mxu1 %v2570_v3  ;;  %2234 = vmatprep.mubr.f32.mxu0 %v3679_v9  ;;  %v2582_v14 = vpack.c.bf16 %v748_v11, %v747_v10  ;;  %v749_v15 = vld [vmem:[%s3663_s16 + $0x40] sm:$0xff]  ;;  %v2538_v16 = vpack.c.bf16 %v574_v13, %v573_v12  ;;  %v575_v17 = vld [vmem:[%s3656_s22 + $0x10] sm:$0xff]  ;;  %v576_v18 = vld [vmem:[%s3656_s22 + $0x18] sm:$0xff] }
  0xe1   : > { %2575 = vmatprep.subr.bf16.mxu1 %v2574_v5  ;;  %v750_v19 = vld [vmem:[%s3663_s16 + $0x48] sm:$0xff]  ;;  %v2542_v20 = vpack.c.bf16 %v576_v18, %v575_v17  ;;  %v577_v21 = vld [vmem:[%s3656_s22 + $0x20] sm:$0xff]  ;;  %v751_v24 = vld [vmem:[%s3663_s16 + $0x50] sm:$0xff] }
  0xe2   : > { %v578_v22 = vld [vmem:[%s3656_s22 + $0x28] sm:$0xff]  ;;  %2539 = vmatprep.subr.bf16.mxu0 %v2538_v16  ;;  %v2586_v23 = vpack.c.bf16 %v750_v19, %v749_v15  ;;  %v752_v26 = vld [vmem:[%s3663_s16 + $0x58] sm:$0xff]  ;;  %v579_v27 = vld [vmem:[%s3656_s22 + $0x30] sm:$0xff]  ;;  %p547_p12 = scmp.lt.s32.totalorder %s4186_s17, 1  ;;  %p2000_p4 = scmp.ne.s32.totalorder %s4186_s17, 0 }
  0xe3   : > { %2541 = vmatpush3.bf16.msra.mxu0 %v2538_v16  ;;  %v2546_v25 = vpack.c.bf16 %v578_v22, %v577_v21  ;;  %v580_v28 = vld [vmem:[%s3656_s22 + $0x38] sm:$0xff]  ;;  %v2590_v29 = vpack.c.bf16 %v752_v26, %v751_v24  ;;  %v753_v30 = vld [vmem:[%s3663_s16 + $0x60] sm:$0xff]  ;;  %v754_v32 = vld [vmem:[%s3663_s16 + $0x68] sm:$0xff] }
  0xe4   : > { %2577 = vmatpush3.bf16.msra.mxu1 %v2574_v5  ;;  %2543 = vmatprep.subr.bf16.mxu0 %v2542_v20  ;;  %v2550_v31 = vpack.c.bf16 %v580_v28, %v579_v27  ;;  %v581_v33 = vld [vmem:[%s3656_s22 + $0x40] sm:$0xff]  ;;  %v582_v34 = vld [vmem:[%s3656_s22 + $0x48] sm:$0xff]  ;;  %v2594_v35 = vpack.c.bf16 %v754_v32, %v753_v30  ;;  %v755_v36 = vld [vmem:[%s3663_s16 + $0x70] sm:$0xff]  ;;  %s3801_s15 = scalar_select %p547_p12, %s4186_s17, 1 }
  0xe5   : > { %2579 = vmatprep.subr.bf16.mxu1 %v2578_v8  ;;  %v2554_v37 = vpack.c.bf16 %v582_v34, %v581_v33  ;;  %v756_v38 = vld [vmem:[%s3663_s16 + $0x78] sm:$0xff]  ;;  %v583_v39 = vld [vmem:[%s3656_s22 + $0x50] sm:$0xff]  ;;  %v585_v43 = vld [vmem:[%s3656_s22 + $0x60] sm:$0xff]  ;;  %s3939_s16 = scalar_lea.vmem [#allocation10], %s3653_s9  ;;  %s3963_s9 = scalar_lea.vmem [#allocation11], %s1991_s25 }
  0xe6   : > { %v584_v40 = vld [vmem:[%s3656_s22 + $0x58] sm:$0xff]  ;;  %v2598_v41 = vpack.c.bf16 %v756_v38, %v755_v36  ;;  %v586_v44 = vld [vmem:[%s3656_s22 + $0x68] sm:$0xff]  ;;  %v587_v46 = vld [vmem:[%s3656_s22 + $0x70] sm:$0xff]  ;;  %s552_s5 = scalar_lea.vmem %s4187_s2, %s3801_s15  ;;  %s549_s29 = scalar_lea.vmem %s4188_s27, %s3801_s15 }
  0xe7   : > { %2545 = vmatpush3.bf16.msra.mxu0 %v2542_v20  ;;  %v2558_v42 = vpack.c.bf16 %v584_v40, %v583_v39  ;;  %v2562_v45 = vpack.c.bf16 %v586_v44, %v585_v43  ;;  %v588_v47 = vld [vmem:[%s3656_s22 + $0x78] sm:$0xff]  ;;  %v3710_v48 = vld [vmem:[%s3645_s23 + $0x8] sm:$0xff]  ;;  %v3713_v49 = vld [vmem:[%s3645_s23 + $0x10] sm:$0xff]  ;;  %s555_s22 = scalar_lea.vmem %s4189_s7, %s3801_s15  ;;  %s4190_s15 = sld [smem:[#allocation35_spill]] (!%p2000_p4) }
  0xe8   : > { %2581 = vmatpush3.bf16.msra.mxu1 %v2578_v8  ;;  %2547 = vmatprep.subr.bf16.mxu0 %v2546_v25  ;;  %v2566_v50 = vpack.c.bf16 %v588_v47, %v587_v46  ;;  %v3718_v51 = vld [vmem:[%s3645_s23 + $0x18] sm:$0xff]  ;;  %v3721_v52 = vld [vmem:[%s3645_s23 + $0x20] sm:$0xff]  ;;  %v3726_v53 = vld [vmem:[%s3645_s23 + $0x28] sm:$0xff] }
  0xe9   : > { %2583 = vmatprep.subr.bf16.mxu1 %v2582_v14  ;;  %v3729_v54 = vld [vmem:[%s3645_s23 + $0x30] sm:$0xff]  ;;  %v3735_v55 = vld [vmem:[%s3645_s23 + $0x38] sm:$0xff]  ;;  %v3739_v56 = vld [vmem:[%s3645_s23 + $0x40] sm:$0xff] }
  0xea   : > { %v3745_v57 = vld [vmem:[%s3645_s23 + $0x48] sm:$0xff]  ;;  %v3749_v58 = vld [vmem:[%s3645_s23 + $0x50] sm:$0xff]  ;;  %v3755_v59 = vld [vmem:[%s3645_s23 + $0x58] sm:$0xff] }
  0xeb   : > { %2549 = vmatpush3.bf16.msra.mxu0 %v2546_v25  ;;  %v3759_v60 = vld [vmem:[%s3645_s23 + $0x60] sm:$0xff]  ;;  %v3765_v61 = vld [vmem:[%s3645_s23 + $0x68] sm:$0xff]  ;;  %v3769_v62 = vld [vmem:[%s3645_s23 + $0x70] sm:$0xff] }
  0xec   : > { %2585 = vmatpush3.bf16.msra.mxu1 %v2582_v14  ;;  %2551 = vmatprep.subr.bf16.mxu0 %v2550_v31  ;;  %v3775_v63 = vld [vmem:[%s3645_s23 + $0x78] sm:$0xff]  ;;  %v909_v0 = vld [vmem:[%s3666_s30] sm:$0xff]  ;;  %v910_v1 = vld [vmem:[%s3666_s30 + $0x8] sm:$0xff] }
  0xed   : > { %2587 = vmatprep.subr.bf16.mxu1 %v2586_v23  ;;  %v911_v2 = vld [vmem:[%s3666_s30 + $0x10] sm:$0xff]  ;;  %v2602_v3 = vpack.c.bf16 %v910_v1, %v909_v0  ;;  %v912_v4 = vld [vmem:[%s3666_s30 + $0x18] sm:$0xff]  ;;  %v913_v6 = vld [vmem:[%s3666_s30 + $0x20] sm:$0xff] }
  0xee   : > { %v2606_v5 = vpack.c.bf16 %v912_v4, %v911_v2  ;;  %v914_v7 = vld [vmem:[%s3666_s30 + $0x28] sm:$0xff]  ;;  %v915_v10 = vld [vmem:[%s3666_s30 + $0x30] sm:$0xff]  ;;  %v917_v12 = vld [vmem:[%s3666_s30 + $0x40] sm:$0xff] }
  0xef   : > { %2553 = vmatpush3.bf16.msra.mxu0 %v2550_v31  ;;  %v2610_v8 = vpack.c.bf16 %v914_v7, %v913_v6  ;;  %v918_v13 = vld [vmem:[%s3666_s30 + $0x48] sm:$0xff]  ;;  %v919_v15 = vld [vmem:[%s3666_s30 + $0x50] sm:$0xff]  ;;  %v920_v16 = vld [vmem:[%s3666_s30 + $0x58] sm:$0xff] }
  0xf0   : > { %2589 = vmatpush3.bf16.msra.mxu1 %v2586_v23  ;;  %2555 = vmatprep.subr.bf16.mxu0 %v2554_v37  ;;  %v2618_v14 = vpack.c.bf16 %v918_v13, %v917_v12  ;;  %v2622_v17 = vpack.c.bf16 %v920_v16, %v919_v15  ;;  %v921_v18 = vld [vmem:[%s3666_s30 + $0x60] sm:$0xff]  ;;  %v922_v19 = vld [vmem:[%s3666_s30 + $0x68] sm:$0xff]  ;;  %v923_v21 = vld [vmem:[%s3666_s30 + $0x70] sm:$0xff] }
  0xf1   : > { %2591 = vmatprep.subr.bf16.mxu1 %v2590_v29  ;;  %v2626_v20 = vpack.c.bf16 %v922_v19, %v921_v18  ;;  %v924_v22 = vld [vmem:[%s3666_s30 + $0x78] sm:$0xff]  ;;  %v3809_v24 = vld [vmem:[%s552_s5] ss:$0 sm:$0xff] }
  0xf2   : > { %v2630_v23 = vpack.c.bf16 %v924_v22, %v923_v21  ;;  %v3821_v34 = vld [vmem:[%s549_s29] ss:$0 sm:$0xff] }
  0xf3   : > { %2557 = vmatpush3.bf16.msra.mxu0 %v2554_v37 }
  0xf4   : > { %2593 = vmatpush3.bf16.msra.mxu1 %v2590_v29  ;;  %2559 = vmatprep.subr.bf16.mxu0 %v2558_v42 }
  0xf5   : > { %2595 = vmatprep.subr.bf16.mxu1 %v2594_v35 }
  0xf7   : > { %2561 = vmatpush3.bf16.msra.mxu0 %v2558_v42 }
  0xf8   : > { %2597 = vmatpush3.bf16.msra.mxu1 %v2594_v35  ;;  %2563 = vmatprep.subr.bf16.mxu0 %v2562_v45 }
  0xf9   : > { %2599 = vmatprep.subr.bf16.mxu1 %v2598_v41 }
  0xfb   : > { %2565 = vmatpush3.bf16.msra.mxu0 %v2562_v45 }
  0xfc   : > { %2601 = vmatpush3.bf16.msra.mxu1 %v2598_v41  ;;  %2567 = vmatprep.subr.bf16.mxu0 %v2566_v50 }
  0xff   : > { %2291 = vmatmul.mubr.f32.vlgmr.msra.gmra.mrb[0].mxu1 %v3710_v48  ;;  %2569 = vmatpush3.bf16.msra.mxu0 %v2566_v50 }
 0x100   : > { %2293 = vmatprep.mubr.f32.mxu1 %v3713_v49  ;;  %2603 = vmatprep.subr.bf16.mxu0 %v2602_v3 }
 0x102   : > { %2235 = vmatmul.mubr.f32.vlgmr.msra.gmra.mrb[0].mxu0 %v3710_v48 }
 0x103   : > { %2294 = vmatmul.mubr.f32.gmra.mrb[2].mxu1 %v3718_v51  ;;  %2237 = vmatprep.mubr.f32.mxu0 %v3713_v49 }
 0x104   : > { %2296 = vmatprep.mubr.f32.mxu1 %v3721_v52  ;;  %2605 = vmatpush3.bf16.msra.mxu0 %v2602_v3 }
 0x105   : > { %2607 = vmatprep.subr.bf16.mxu0 %v2606_v5 }
 0x106   : > { %2238 = vmatmul.mubr.f32.gmra.mrb[2].mxu0 %v3718_v51 }
 0x107   : > { %2297 = vmatmul.mubr.f32.gmra.mrb[4].mxu1 %v3726_v53  ;;  %2240 = vmatprep.mubr.f32.mxu0 %v3721_v52 }
 0x108   : > { %2299 = vmatprep.mubr.f32.mxu1 %v3729_v54  ;;  %2609 = vmatpush3.bf16.msra.mxu0 %v2606_v5 }
 0x109   : > { %2611 = vmatprep.subr.bf16.mxu0 %v2610_v8 }
 0x10a   : > { %2241 = vmatmul.mubr.f32.gmra.mrb[4].mxu0 %v3726_v53 }
 0x10b   : > { %2300 = vmatmul.mubr.f32.gmra.mrb[6].mxu1 %v3735_v55  ;;  %2243 = vmatprep.mubr.f32.mxu0 %v3729_v54 }
 0x10c   : > { %2302 = vmatprep.mubr.f32.mxu1 %v3739_v56  ;;  %2613 = vmatpush3.bf16.msra.mxu0 %v2610_v8 }
 0x10e   : > { %2244 = vmatmul.mubr.f32.gmra.mrb[6].mxu0 %v3735_v55 }
 0x10f   : > { %2303 = vmatmul.mubr.f32.gmra.mrb[8].mxu1 %v3745_v57  ;;  %2246 = vmatprep.mubr.f32.mxu0 %v3739_v56 }
 0x110   : > { %2305 = vmatprep.mubr.f32.mxu1 %v3749_v58 }
 0x112   : > { %2247 = vmatmul.mubr.f32.gmra.mrb[8].mxu0 %v3745_v57 }
 0x113   : > { %2306 = vmatmul.mubr.f32.gmra.mrb[10].mxu1 %v3755_v59  ;;  %2249 = vmatprep.mubr.f32.mxu0 %v3749_v58 }
 0x114   : > { %2308 = vmatprep.mubr.f32.mxu1 %v3759_v60 }
 0x116   : > { %2250 = vmatmul.mubr.f32.gmra.mrb[10].mxu0 %v3755_v59 }
 0x117   : > { %2309 = vmatmul.mubr.f32.gmra.mrb[12].mxu1 %v3765_v61  ;;  %2252 = vmatprep.mubr.f32.mxu0 %v3759_v60 }
 0x118   : > { %2311 = vmatprep.mubr.f32.mxu1 %v3769_v62 }
 0x11a   : > { %2253 = vmatmul.mubr.f32.gmra.mrb[12].mxu0 %v3765_v61 }
 0x11b   : > { %2312 = vmatmul.mubr.f32.gmra.mrb[14].mxu1 %v3775_v63  ;;  %2255 = vmatprep.mubr.f32.mxu0 %v3769_v62 }
 0x11e   : > { %2256 = vmatmul.mubr.f32.gmra.mrb[14].mxu0 %v3775_v63 }
 0x11f   : > { %2346 = vmatprep.mubr.f32.mxu0 %v3679_v9  ;;  %v916_v9 = vld [vmem:[%s3666_s30 + $0x38] sm:$0xff] }
 0x120   : > { %v2614_v11 = vpack.c.bf16 %v916_v9, %v915_v10 }
 0x122   : > { %2615 = vmatprep.subr.bf16.mxu0 %v2614_v11 }
 0x123   : > { %2617 = vmatpush3.bf16.msra.mxu0 %v2614_v11 }
 0x124   : > { %2619 = vmatprep.subr.bf16.mxu0 %v2618_v14 }
 0x127   : > { %2621 = vmatpush3.bf16.msra.mxu0 %v2618_v14 }
 0x128   : > { %2623 = vmatprep.subr.bf16.mxu0 %v2622_v17 }
 0x12b   : > { %2625 = vmatpush3.bf16.msra.mxu0 %v2622_v17 }
 0x12c   : > { %2627 = vmatprep.subr.bf16.mxu0 %v2626_v20 }
 0x12f   : > { %2629 = vmatpush3.bf16.msra.mxu0 %v2626_v20 }
 0x130   : > { %2631 = vmatprep.subr.bf16.mxu0 %v2630_v23 }
 0x133   : > { %2633 = vmatpush3.bf16.msra.mxu0 %v2630_v23 }
 0x136   : > { %2347 = vmatmul.mubr.f32.vlgmr.msra.gmra.mrb[16].mxu0 %v3710_v48 }
 0x137   : > { %2349 = vmatprep.mubr.f32.mxu0 %v3713_v49 }
 0x13a   : > { %2350 = vmatmul.mubr.f32.gmra.mrb[18].mxu0 %v3718_v51 }
 0x13b   : > { %2352 = vmatprep.mubr.f32.mxu0 %v3721_v52 }
 0x13e   : > { %2353 = vmatmul.mubr.f32.gmra.mrb[20].mxu0 %v3726_v53 }
 0x13f   : > { %2355 = vmatprep.mubr.f32.mxu0 %v3729_v54 }
 0x142   : > { %2356 = vmatmul.mubr.f32.gmra.mrb[22].mxu0 %v3735_v55 }
 0x143   : > { %2358 = vmatprep.mubr.f32.mxu0 %v3739_v56 }
 0x146   : > { %2359 = vmatmul.mubr.f32.gmra.mrb[24].mxu0 %v3745_v57 }
 0x147   : > { %2361 = vmatprep.mubr.f32.mxu0 %v3749_v58 }
 0x14a   : > { %2362 = vmatmul.mubr.f32.gmra.mrb[26].mxu0 %v3755_v59 }
 0x14b   : > { %2364 = vmatprep.mubr.f32.mxu0 %v3759_v60 }
 0x14e   : > { %2365 = vmatmul.mubr.f32.gmra.mrb[28].mxu0 %v3765_v61 }
 0x14f   : > { %2367 = vmatprep.mubr.f32.mxu0 %v3769_v62 }
 0x152   : > { %2368 = vmatmul.mubr.f32.gmra.mrb[30].mxu0 %v3775_v63 }
 0x1d2   : > { %v2292_v25 = vpop.f32.mrb[0].mxu1 }
 0x1d3   : > { %v836_v26 = vadd.f32 %v2292_v25, %v3809_v24  ;;  %v830_v27 = vpop.f32.mrb[1].mxu1 }
 0x1d4   : > { %v831_v28 = vadd.f32 %v3809_v24, %v830_v27 }
 0x1d5   : > { %v3823_v37 = vpop.f32.mrb[0].mxu0 }
 0x1d6   : > { %v2634_v29 = vpack.c.bf16 %v836_v26, %v831_v28  ;;  %v2295_v30 = vpop.f32.mrb[2].mxu1  ;;  %v662_v40 = vpop.f32.mrb[1].mxu0  ;;  %v668_v63 = vadd.f32 %v3823_v37, %v3821_v34 }
 0x1d7   : > { %v846_v31 = vadd.f32 %v2295_v30, %v3809_v24  ;;  %v840_v32 = vpop.f32.mrb[3].mxu1  ;;  %v663_v42 = vadd.f32 %v3821_v34, %v662_v40 }
 0x1d8   : > { %2635 = vmatprep.subr.bf16.mxu1 %v2634_v29  ;;  %v841_v33 = vadd.f32 %v3809_v24, %v840_v32 }
 0x1d9   : > { %2637 = vmatpush3.bf16.xpose.msra.mxu1 %v2634_v29  ;;  %v1077_v45 = vmul.f32 0.088388346, %v663_v42  ;;  %v3830_v46 = vpop.f32.mrb[2].mxu0 }
 0x1da   : > { %v2638_v35 = vpack.c.bf16 %v846_v31, %v841_v33  ;;  %v2298_v36 = vpop.f32.mrb[4].mxu1  ;;  %v3833_v49 = vpop.f32.mrb[3].mxu0 }
 0x1db   : > { %v856_v38 = vadd.f32 %v2298_v36, %v3809_v24  ;;  %v850_v39 = vpop.f32.mrb[5].mxu1  ;;  %2402 = vmatprep.mubr.f32.mxu1 %v1077_v45  ;;  %v673_v62 = vadd.f32 %v3821_v34, %v3833_v49  ;;  %v1078_v36 = vmul.f32 0.088388346, %v668_v63 }
 0x1dc   : > { %2639 = vmatprep.subr.bf16.mxu1 %v2638_v35  ;;  %v851_v41 = vadd.f32 %v3809_v24, %v850_v39 }
 0x1dd   : > { %v2242_v0 = vpop.f32.mrb[4].mxu0  ;;  %v1079_v33 = vmul.f32 0.088388346, %v673_v62 }
 0x1de   : > { %v2642_v43 = vpack.c.bf16 %v856_v38, %v851_v41  ;;  %v2301_v44 = vpop.f32.mrb[6].mxu1  ;;  %v3840_v3 = vadd.f32 %v2242_v0, %v3821_v34  ;;  %v682_v4 = vpop.f32.mrb[5].mxu0  ;;  %v678_v38 = vadd.f32 %v3830_v46, %v3821_v34 }
 0x1df   : > { %v866_v47 = vadd.f32 %v2301_v44, %v3809_v24  ;;  %v860_v48 = vpop.f32.mrb[7].mxu1 }
 0x1e0   : > { %v861_v50 = vadd.f32 %v3809_v24, %v860_v48  ;;  %v1080_v40 = vmul.f32 0.088388346, %v678_v38  ;;  %v1082_v41 = vmul.f32 0.088388346, %v3840_v3 }
 0x1e1   : > { %2641 = vmatpush3.bf16.xpose.msra.mxu1 %v2638_v35  ;;  %v2245_v6 = vpop.f32.mrb[6].mxu0  ;;  %v683_v35 = vadd.f32 %v3821_v34, %v682_v4 }
 0x1e2   : > { %2643 = vmatprep.subr.bf16.mxu1 %v2642_v43  ;;  %v2646_v51 = vpack.c.bf16 %v866_v47, %v861_v50  ;;  %v2304_v52 = vpop.f32.mrb[8].mxu1  ;;  %v698_v10 = vadd.f32 %v2245_v6, %v3821_v34  ;;  %v692_v9 = vpop.f32.mrb[7].mxu0  ;;  %v3880_v50 = vld [vmem:[%s555_s22] ss:$0 sm:$0xff] }
 0x1e3   : > { %v876_v1 = vadd.f32 %v2304_v52, %v3809_v24  ;;  %v870_v2 = vpop.f32.mrb[9].mxu1  ;;  %v693_v12 = vadd.f32 %v3821_v34, %v692_v9  ;;  %v1081_v39 = vmul.f32 0.088388346, %v683_v35 }
 0x1e4   : > { %v871_v53 = vadd.f32 %v3809_v24, %v870_v2 }
 0x1e5   : > { %v2248_v13 = vpop.f32.mrb[8].mxu0  ;;  %v1083_v42 = vmul.f32 0.088388346, %v693_v12 }
 0x1e6   : > { %v2650_v5 = vpack.c.bf16 %v876_v1, %v871_v53  ;;  %v2307_v54 = vpop.f32.mrb[10].mxu1  ;;  %v708_v16 = vadd.f32 %v2248_v13, %v3821_v34  ;;  %v702_v17 = vpop.f32.mrb[9].mxu0 }
 0x1e7   : > { %v886_v7 = vadd.f32 %v2307_v54, %v3809_v24  ;;  %v880_v8 = vpop.f32.mrb[11].mxu1  ;;  %v703_v18 = vadd.f32 %v3821_v34, %v702_v17 }
 0x1e8   : > { %v881_v11 = vadd.f32 %v3809_v24, %v880_v8  ;;  %v1086_v37 = vmul.f32 0.088388346, %v708_v16 }
 0x1e9   : > { %2645 = vmatpush3.bf16.xpose.msra.mxu1 %v2642_v43  ;;  %v2251_v20 = vpop.f32.mrb[10].mxu0  ;;  %v1084_v43 = vmul.f32 0.088388346, %v698_v10  ;;  %v1085_v44 = vmul.f32 0.088388346, %v703_v18 }
 0x1ea   : > { %2647 = vmatprep.subr.bf16.mxu1 %v2646_v51  ;;  %v2654_v55 = vpack.c.bf16 %v886_v7, %v881_v11  ;;  %v2310_v56 = vpop.f32.mrb[12].mxu1  ;;  %v718_v23 = vadd.f32 %v2251_v20, %v3821_v34  ;;  %v712_v25 = vpop.f32.mrb[11].mxu0 }
 0x1eb   : > { %v896_v14 = vadd.f32 %v2310_v56, %v3809_v24  ;;  %v890_v15 = vpop.f32.mrb[13].mxu1  ;;  %v713_v59 = vadd.f32 %v3821_v34, %v712_v25 }
 0x1ec   : > { %v891_v57 = vadd.f32 %v3809_v24, %v890_v15  ;;  %v1088_v47 = vmul.f32 0.088388346, %v718_v23 }
 0x1ed   : > { %v2254_v27 = vpop.f32.mrb[12].mxu0  ;;  %v1087_v45 = vmul.f32 0.088388346, %v713_v59 }
 0x1ee   : > { %v2658_v58 = vpack.c.bf16 %v896_v14, %v891_v57  ;;  %v2313_v19 = vpop.f32.mrb[14].mxu1  ;;  %v728_v28 = vadd.f32 %v2254_v27, %v3821_v34  ;;  %v722_v29 = vpop.f32.mrb[13].mxu0 }
 0x1ef   : > { %v906_v21 = vadd.f32 %v2313_v19, %v3809_v24  ;;  %v900_v22 = vpop.f32.mrb[15].mxu1  ;;  %v723_v30 = vadd.f32 %v3821_v34, %v722_v29 }
 0x1f0   : > { %v901_v26 = vadd.f32 %v3809_v24, %v900_v22  ;;  %v1090_v46 = vmul.f32 0.088388346, %v728_v28 }
 0x1f1   : > { %2649 = vmatpush3.bf16.xpose.msra.mxu1 %v2646_v51  ;;  %v2257_v31 = vpop.f32.mrb[14].mxu0 }
 0x1f2   : > { %2651 = vmatprep.subr.bf16.mxu1 %v2650_v5  ;;  %v2662_v60 = vpack.c.bf16 %v906_v21, %v901_v26  ;;  %v738_v61 = vadd.f32 %v2257_v31, %v3821_v34  ;;  %v732_v32 = vpop.f32.mrb[15].mxu0 }
 0x1f3   : > { %v733_v24 = vadd.f32 %v3821_v34, %v732_v32  ;;  %v1089_v34 = vmul.f32 0.088388346, %v723_v30 }
 0x1f4   : > { %v1092_v49 = vmul.f32 0.088388346, %v738_v61 }
 0x1f5   : > { %v1091_v48 = vmul.f32 0.088388346, %v733_v24 }
 0x1f9   : > { %2653 = vmatpush3.bf16.xpose.msra.mxu1 %v2650_v5 }
 0x1fa   : > { %2655 = vmatprep.subr.bf16.mxu1 %v2654_v55 }
 0x201   : > { %2657 = vmatpush3.bf16.xpose.msra.mxu1 %v2654_v55 }
 0x202   : > { %2659 = vmatprep.subr.bf16.mxu1 %v2658_v58 }
 0x209   : > { %2661 = vmatpush3.bf16.xpose.msra.mxu1 %v2658_v58  ;;  %v2348_v51 = vpop.f32.mrb[16].mxu0 }
 0x20a   : > { %2663 = vmatprep.subr.bf16.mxu1 %v2662_v60  ;;  %v1004_v52 = vadd.f32 %v2348_v51, %v3880_v50  ;;  %v998_v0 = vpop.f32.mrb[17].mxu0 }
 0x20b   : > { %v999_v1 = vadd.f32 %v3880_v50, %v998_v0 }
 0x20d   : > { %v2666_v2 = vpack.c.bf16 %v1004_v52, %v999_v1  ;;  %v2351_v3 = vpop.f32.mrb[18].mxu0 }
 0x20e   : > { %v1014_v4 = vadd.f32 %v2351_v3, %v3880_v50  ;;  %v1008_v53 = vpop.f32.mrb[19].mxu0 }
 0x20f   : > { %v1009_v5 = vadd.f32 %v3880_v50, %v1008_v53  ;;  %2667 = vmatprep.subr.bf16.mxu0 %v2666_v2 }
 0x210   : > { %2669 = vmatpush3.bf16.msra.mxu0 %v2666_v2 }
 0x211   : > { %2665 = vmatpush3.bf16.xpose.msra.mxu1 %v2662_v60  ;;  %v2670_v54 = vpack.c.bf16 %v1014_v4, %v1009_v5  ;;  %v2354_v6 = vpop.f32.mrb[20].mxu0 }
 0x212   : > { %v1024_v7 = vadd.f32 %v2354_v6, %v3880_v50  ;;  %v1018_v8 = vpop.f32.mrb[21].mxu0 }
 0x213   : > { %v1019_v10 = vadd.f32 %v3880_v50, %v1018_v8  ;;  %2671 = vmatprep.subr.bf16.mxu0 %v2670_v54 }
 0x214   : > { %2673 = vmatpush3.bf16.msra.mxu0 %v2670_v54 }
 0x215   : > { %v2674_v9 = vpack.c.bf16 %v1024_v7, %v1019_v10  ;;  %v2357_v11 = vpop.f32.mrb[22].mxu0 }
 0x216   : > { %v1034_v12 = vadd.f32 %v2357_v11, %v3880_v50  ;;  %v1028_v55 = vpop.f32.mrb[23].mxu0 }
 0x217   : > { %v1029_v56 = vadd.f32 %v3880_v50, %v1028_v55  ;;  %2675 = vmatprep.subr.bf16.mxu0 %v2674_v9 }
 0x218   : > { %2403 = vmatmul.mubr.f32.vlgmr.msra.gmra.mrb[16].mxu1 %v1078_v36  ;;  %2677 = vmatpush3.bf16.msra.mxu0 %v2674_v9 }
 0x219   : > { %2405 = vmatprep.mubr.f32.mxu1 %v1079_v33  ;;  %v2678_v13 = vpack.c.bf16 %v1034_v12, %v1029_v56  ;;  %v2360_v14 = vpop.f32.mrb[24].mxu0 }
 0x21a   : > { %v1044_v15 = vadd.f32 %v2360_v14, %v3880_v50  ;;  %v1038_v16 = vpop.f32.mrb[25].mxu0 }
 0x21b   : > { %v1039_v17 = vadd.f32 %v3880_v50, %v1038_v16  ;;  %2679 = vmatprep.subr.bf16.mxu0 %v2678_v13 }
 0x21c   : > { %2406 = vmatmul.mubr.f32.gmra.mrb[18].mxu1 %v1080_v40  ;;  %2681 = vmatpush3.bf16.msra.mxu0 %v2678_v13 }
 0x21d   : > { %2408 = vmatprep.mubr.f32.mxu1 %v1081_v39  ;;  %v2682_v57 = vpack.c.bf16 %v1044_v15, %v1039_v17  ;;  %v2363_v18 = vpop.f32.mrb[26].mxu0 }
 0x21e   : > { %v1054_v58 = vadd.f32 %v2363_v18, %v3880_v50  ;;  %v1048_v19 = vpop.f32.mrb[27].mxu0 }
 0x21f   : > { %v1049_v20 = vadd.f32 %v3880_v50, %v1048_v19  ;;  %2683 = vmatprep.subr.bf16.mxu0 %v2682_v57 }
 0x220   : > { %2409 = vmatmul.mubr.f32.gmra.mrb[20].mxu1 %v1082_v41  ;;  %2685 = vmatpush3.bf16.msra.mxu0 %v2682_v57 }
 0x221   : > { %2411 = vmatprep.mubr.f32.mxu1 %v1083_v42  ;;  %v2686_v21 = vpack.c.bf16 %v1054_v58, %v1049_v20  ;;  %v2366_v31 = vpop.f32.mrb[28].mxu0 }
 0x222   : > { %v1064_v32 = vadd.f32 %v2366_v31, %v3880_v50  ;;  %v1058_v24 = vpop.f32.mrb[29].mxu0 }
 0x223   : > { %2687 = vmatprep.subr.bf16.mxu0 %v2686_v21  ;;  %v1059_v63 = vadd.f32 %v3880_v50, %v1058_v24 }
 0x224   : > { %2412 = vmatmul.mubr.f32.gmra.mrb[22].mxu1 %v1084_v43  ;;  %2689 = vmatpush3.bf16.msra.mxu0 %v2686_v21 }
 0x225   : > { %2414 = vmatprep.mubr.f32.mxu1 %v1085_v44  ;;  %v2690_v33 = vpack.c.bf16 %v1064_v32, %v1059_v63  ;;  %v2369_v36 = vpop.f32.mrb[30].mxu0 }
 0x226   : > { %v1074_v39 = vadd.f32 %v2369_v36, %v3880_v50  ;;  %v1068_v40 = vpop.f32.mrb[31].mxu0 }
 0x227   : > { %2691 = vmatprep.subr.bf16.mxu0 %v2690_v33  ;;  %v1069_v41 = vadd.f32 %v3880_v50, %v1068_v40 }
 0x228   : > { %2415 = vmatmul.mubr.f32.gmra.mrb[24].mxu1 %v1086_v37  ;;  %2693 = vmatpush3.bf16.msra.mxu0 %v2690_v33 }
 0x229   : > { %2417 = vmatprep.mubr.f32.mxu1 %v1087_v45  ;;  %v2694_v43 = vpack.c.bf16 %v1074_v39, %v1069_v41 }
 0x22b   : > { %2695 = vmatprep.subr.bf16.mxu0 %v2694_v43 }
 0x22c   : > { %2418 = vmatmul.mubr.f32.gmra.mrb[26].mxu1 %v1088_v47  ;;  %2697 = vmatpush3.bf16.msra.mxu0 %v2694_v43 }
 0x22d   : > { %2420 = vmatprep.mubr.f32.mxu1 %v1089_v34 }
 0x230   : > { %2421 = vmatmul.mubr.f32.gmra.mrb[28].mxu1 %v1090_v46 }
 0x231   : > { %2423 = vmatprep.mubr.f32.mxu1 %v1091_v48 }
 0x234   : > { %2424 = vmatmul.mubr.f32.gmra.mrb[30].mxu1 %v1092_v49 }
 0x2eb   : > { %v2404_v22 = vpop.f32.mrb[16].mxu1 }
 0x2ec   : > { %v1159_v23 = vpop.f32.mrb[17].mxu1 }
 0x2ed   : > { %1238 = vmax.xlane.f32.xlu0 %v1159_v23 }
 0x2ef   : > { %v2407_v25 = vpop.f32.mrb[18].mxu1 }
 0x2f0   : > { %v1169_v26 = vpop.f32.mrb[19].mxu1 }
 0x2f1   : > { %1240 = vmax.xlane.f32.xlu0 %v2404_v22  ;;  %1242 = vmax.xlane.f32.xlu1 %v1169_v26 }
 0x2f3   : > { %v3894_v59 = vpop.f32.mrb[20].mxu1 }
 0x2f4   : > { %v1179_v60 = vpop.f32.mrb[21].mxu1 }
 0x2f5   : > { %1244 = vmax.xlane.f32.xlu1 %v2407_v25  ;;  %1246 = vmax.xlane.f32.xlu0 %v1179_v60 }
 0x2f7   : > { %v3896_v27 = vpop.f32.mrb[22].mxu1 }
 0x2f8   : > { %v1189_v28 = vpop.f32.mrb[23].mxu1 }
 0x2f9   : > { %1248 = vmax.xlane.f32.xlu1 %v3894_v59  ;;  %1250 = vmax.xlane.f32.xlu0 %v1189_v28 }
 0x2fb   : > { %v3899_v29 = vpop.f32.mrb[24].mxu1 }
 0x2fc   : > { %v3901_v30 = vpop.f32.mrb[25].mxu1 }
 0x2fd   : > { %1252 = vmax.xlane.f32.xlu1 %v3896_v27  ;;  %1254 = vmax.xlane.f32.xlu0 %v3901_v30 }
 0x2ff   : > { %v3905_v61 = vpop.f32.mrb[26].mxu1 }
 0x300   : > { %v3908_v62 = vpop.f32.mrb[27].mxu1 }
 0x301   : > { %1256 = vmax.xlane.f32.xlu1 %v3899_v29  ;;  %1258 = vmax.xlane.f32.xlu0 %v3908_v62 }
 0x303   : > { %v3913_v35 = vpop.f32.mrb[28].mxu1 }
 0x304   : > { %v3915_v38 = vpop.f32.mrb[29].mxu1 }
 0x305   : > { %1260 = vmax.xlane.f32.xlu1 %v3905_v61  ;;  %1262 = vmax.xlane.f32.xlu0 %v3915_v38 }
 0x307   : > { %v3921_v42 = vpop.f32.mrb[30].mxu1 }
 0x308   : > { %v3923_v44 = vpop.f32.mrb[31].mxu1 }
 0x309   : > { %1264 = vmax.xlane.f32.xlu1 %v3913_v35  ;;  %1266 = vmax.xlane.f32.xlu0 %v3923_v44 }
 0x30d   : > { %1268 = vmax.xlane.f32.xlu1 %v3921_v42 }
 0x37a   : > { %v1239_v37 = vpop.xlane.xlu0 %1238 }
 0x37b   : > { %v1270_v45 = vsub.f32 %v1159_v23, %v1239_v37  ;;  %v1527_v37 = vld [vmem:[%s3939_s16] sm:$0xff] }
 0x37d   : > { %v1286_v47 = vmul.f32 1.442695, %v1270_v45  ;;  %v1528_v45 = vld [vmem:[%s3939_s16 + $0x8] sm:$0xff] }
 0x37e   : > { %v1241_v34 = vpop.xlane.xlu0 %1240  ;;  %v1243_v46 = vpop.xlane.xlu1 %1242 }
 0x37f   : > { %2873 = vpow2.f32 %v1286_v47  ;;  %v1271_v48 = vsub.f32 %v2404_v22, %v1241_v34  ;;  %v1272_v49 = vsub.f32 %v1169_v26, %v1243_v46  ;;  %v2698_v47 = vpack.c.bf16 %v1528_v45, %v1527_v37  ;;  %v1529_v34 = vld [vmem:[%s3939_s16 + $0x10] sm:$0xff]  ;;  %v1530_v46 = vld [vmem:[%s3939_s16 + $0x18] sm:$0xff] }
 0x381   : > { %v1288_v50 = vmul.f32 1.442695, %v1271_v48  ;;  %v1290_v51 = vmul.f32 1.442695, %v1272_v49  ;;  %2699 = vmatprep.subr.bf16.mxu0 %v2698_v47  ;;  %2730 = vmatprep.subr.bf16.mxu1 %v2698_v47  ;;  %v1531_v48 = vld [vmem:[%s3939_s16 + $0x20] sm:$0xff]  ;;  %v2702_v49 = vpack.c.bf16 %v1530_v46, %v1529_v34 }
 0x382   : > { %v1245_v52 = vpop.xlane.xlu1 %1244  ;;  %v1247_v0 = vpop.xlane.xlu0 %1246  ;;  %2738 = vmatpush3.bf16.msra.mxu1 %v2698_v47 }
 0x383   : > { %2875 = vpow2.f32 %v1288_v50  ;;  %v1273_v1 = vsub.f32 %v2407_v25, %v1245_v52  ;;  %v1274_v2 = vsub.f32 %v1179_v60, %v1247_v0  ;;  %v1532_v50 = vld [vmem:[%s3939_s16 + $0x28] sm:$0xff]  ;;  %v1533_v52 = vld [vmem:[%s3939_s16 + $0x30] sm:$0xff]  ;;  %v1534_v0 = vld [vmem:[%s3939_s16 + $0x38] sm:$0xff]  ;;  %2731 = vmatprep.subr.bf16.mxu1 %v2702_v49 }
 0x384   : > { %2877 = vpow2.f32 %v1290_v51  ;;  %v2706_v51 = vpack.c.bf16 %v1532_v50, %v1531_v48 }
 0x385   : > { %v1292_v3 = vmul.f32 1.442695, %v1273_v1  ;;  %v1294_v4 = vmul.f32 1.442695, %v1274_v2  ;;  %v2710_v1 = vpack.c.bf16 %v1534_v0, %v1533_v52  ;;  %v1535_v2 = vld [vmem:[%s3939_s16 + $0x40] sm:$0xff] }
 0x386   : > { %v1249_v53 = vpop.xlane.xlu1 %1248  ;;  %v1251_v5 = vpop.xlane.xlu0 %1250  ;;  %2739 = vmatpush3.bf16.msra.mxu1 %v2702_v49 }
 0x387   : > { %2879 = vpow2.f32 %v1292_v3  ;;  %v1275_v54 = vsub.f32 %v3894_v59, %v1249_v53  ;;  %v1276_v6 = vsub.f32 %v1189_v28, %v1251_v5  ;;  %2732 = vmatprep.subr.bf16.mxu1 %v2706_v51  ;;  %v1536_v3 = vld [vmem:[%s3939_s16 + $0x48] sm:$0xff]  ;;  %v1537_v53 = vld [vmem:[%s3939_s16 + $0x50] sm:$0xff]  ;;  %v1538_v5 = vld [vmem:[%s3939_s16 + $0x58] sm:$0xff] }
 0x388   : > { %2881 = vpow2.f32 %v1294_v4  ;;  %v2714_v4 = vpack.c.bf16 %v1536_v3, %v1535_v2 }
 0x389   : > { %v2874_v7 = vpop.eup %2873  ;;  %v1296_v8 = vmul.f32 1.442695, %v1275_v54  ;;  %v1298_v10 = vmul.f32 1.442695, %v1276_v6  ;;  %v2718_v54 = vpack.c.bf16 %v1538_v5, %v1537_v53  ;;  %v1539_v6 = vld [vmem:[%s3939_s16 + $0x60] sm:$0xff] }
 0x38a   : > { %2458 = vmatprep.mubr.f32.mxu0 %v2874_v7  ;;  %v1253_v9 = vpop.xlane.xlu1 %1252  ;;  %v1255_v11 = vpop.xlane.xlu0 %1254  ;;  %2740 = vmatpush3.bf16.msra.mxu1 %v2706_v51 }
 0x38b   : > { %2883 = vpow2.f32 %v1296_v8  ;;  %v1277_v12 = vsub.f32 %v3896_v27, %v1253_v9  ;;  %v1278_v55 = vsub.f32 %v3901_v30, %v1255_v11  ;;  %2733 = vmatprep.subr.bf16.mxu1 %v2710_v1  ;;  %v1542_v9 = vld [vmem:[%s3939_s16 + $0x78] sm:$0xff] }
 0x38c   : > { %2885 = vpow2.f32 %v1298_v10  ;;  %v1541_v10 = vld [vmem:[%s3939_s16 + $0x70] sm:$0xff] }
 0x38d   : > { %v2876_v56 = vpop.eup %2875  ;;  %v1300_v13 = vmul.f32 1.442695, %v1277_v12  ;;  %v1302_v14 = vmul.f32 1.442695, %v1278_v55  ;;  %v2726_v11 = vpack.c.bf16 %v1542_v9, %v1541_v10 }
 0x38e   : > { %v2878_v15 = vpop.eup %2877  ;;  %2459 = vmatmul.mubr.f32.vlgmr.msra.gmra.mrb[32].mxu0 %v2876_v56  ;;  %v1257_v16 = vpop.xlane.xlu1 %1256  ;;  %1320 = vadd.xlane.f32.xlu0 %v2876_v56 }
 0x38f   : > { %v1259_v17 = vpop.xlane.xlu0 %1258  ;;  %2887 = vpow2.f32 %v1300_v13  ;;  %v1279_v57 = vsub.f32 %v3899_v29, %v1257_v16  ;;  %2461 = vmatprep.mubr.f32.mxu0 %v2878_v15  ;;  %2701 = vmatpush3.bf16.msra.mxu0 %v2698_v47 }
 0x390   : > { %v1280_v18 = vsub.f32 %v3908_v62, %v1259_v17  ;;  %2889 = vpow2.f32 %v1302_v14  ;;  %2703 = vmatprep.subr.bf16.mxu0 %v2702_v49  ;;  %2741 = vmatpush3.bf16.msra.mxu1 %v2710_v1 }
 0x391   : > { %v2880_v58 = vpop.eup %2879  ;;  %v1304_v19 = vmul.f32 1.442695, %v1279_v57  ;;  %2734 = vmatprep.subr.bf16.mxu1 %v2714_v4 }
 0x392   : > { %v1306_v20 = vmul.f32 1.442695, %v1280_v18  ;;  %v2882_v21 = vpop.eup %2881  ;;  %2462 = vmatmul.mubr.f32.gmra.mrb[34].mxu0 %v2880_v58  ;;  %v1261_v22 = vpop.xlane.xlu1 %1260  ;;  %1318 = vadd.xlane.f32.xlu0 %v2874_v7  ;;  %v1540_v7 = vld [vmem:[%s3939_s16 + $0x68] sm:$0xff] }
 0x393   : > { %v1263_v23 = vpop.xlane.xlu0 %1262  ;;  %2891 = vpow2.f32 %v1304_v19  ;;  %v1281_v25 = vsub.f32 %v3905_v61, %v1261_v22  ;;  %2464 = vmatprep.mubr.f32.mxu0 %v2882_v21  ;;  %2705 = vmatpush3.bf16.msra.mxu0 %v2702_v49  ;;  %v2722_v8 = vpack.c.bf16 %v1540_v7, %v1539_v6 }
 0x394   : > { %v1282_v26 = vsub.f32 %v3915_v38, %v1263_v23  ;;  %2893 = vpow2.f32 %v1306_v20  ;;  %2707 = vmatprep.subr.bf16.mxu0 %v2706_v51  ;;  %2742 = vmatpush3.bf16.msra.mxu1 %v2714_v4 }
 0x395   : > { %v2884_v59 = vpop.eup %2883  ;;  %v1308_v60 = vmul.f32 1.442695, %v1281_v25  ;;  %2735 = vmatprep.subr.bf16.mxu1 %v2718_v54 }
 0x396   : > { %v1310_v27 = vmul.f32 1.442695, %v1282_v26  ;;  %v2886_v28 = vpop.eup %2885  ;;  %2465 = vmatmul.mubr.f32.gmra.mrb[36].mxu0 %v2884_v59  ;;  %v1265_v29 = vpop.xlane.xlu1 %1264  ;;  %1324 = vadd.xlane.f32.xlu0 %v2880_v58 }
 0x397   : > { %v1267_v30 = vpop.xlane.xlu0 %1266  ;;  %2895 = vpow2.f32 %v1308_v60  ;;  %v1283_v31 = vsub.f32 %v3913_v35, %v1265_v29  ;;  %2467 = vmatprep.mubr.f32.mxu0 %v2886_v28  ;;  %2709 = vmatpush3.bf16.msra.mxu0 %v2706_v51 }
 0x398   : > { %v1284_v32 = vsub.f32 %v3923_v44, %v1267_v30  ;;  %2897 = vpow2.f32 %v1310_v27  ;;  %2711 = vmatprep.subr.bf16.mxu0 %v2710_v1  ;;  %2743 = vmatpush3.bf16.msra.mxu1 %v2718_v54 }
 0x399   : > { %v2888_v61 = vpop.eup %2887  ;;  %v1312_v24 = vmul.f32 1.442695, %v1283_v31  ;;  %2736 = vmatprep.subr.bf16.mxu1 %v2722_v8 }
 0x39a   : > { %v1314_v62 = vmul.f32 1.442695, %v1284_v32  ;;  %v2890_v63 = vpop.eup %2889  ;;  %2468 = vmatmul.mubr.f32.gmra.mrb[38].mxu0 %v2888_v61  ;;  %v1269_v33 = vpop.xlane.xlu1 %1268  ;;  %1322 = vadd.xlane.f32.xlu0 %v2878_v15 }
 0x39b   : > { %2899 = vpow2.f32 %v1312_v24  ;;  %v1285_v36 = vsub.f32 %v3921_v42, %v1269_v33  ;;  %2470 = vmatprep.mubr.f32.mxu0 %v2890_v63  ;;  %2713 = vmatpush3.bf16.msra.mxu0 %v2710_v1 }
 0x39c   : > { %2901 = vpow2.f32 %v1314_v62  ;;  %2715 = vmatprep.subr.bf16.mxu0 %v2714_v4  ;;  %2744 = vmatpush3.bf16.msra.mxu1 %v2722_v8 }
 0x39d   : > { %v2892_v38 = vpop.eup %2891  ;;  %v1316_v39 = vmul.f32 1.442695, %v1285_v36  ;;  %2737 = vmatprep.subr.bf16.mxu1 %v2726_v11 }
 0x39e   : > { %v2894_v40 = vpop.eup %2893  ;;  %2471 = vmatmul.mubr.f32.gmra.mrb[40].mxu0 %v2892_v38  ;;  %1336 = vadd.xlane.f32.xlu1 %v2892_v38 }
 0x39f   : > { %2903 = vpow2.f32 %v1316_v39  ;;  %1328 = vadd.xlane.f32.xlu0 %v2884_v59  ;;  %2473 = vmatprep.mubr.f32.mxu0 %v2894_v40 }
 0x3a0   : > { %2717 = vmatpush3.bf16.msra.mxu0 %v2714_v4  ;;  %2745 = vmatpush3.bf16.msra.mxu1 %v2726_v11 }
 0x3a1   : > { %v2896_v35 = vpop.eup %2895  ;;  %2719 = vmatprep.subr.bf16.mxu0 %v2718_v54 }
 0x3a2   : > { %v2898_v41 = vpop.eup %2897  ;;  %2474 = vmatmul.mubr.f32.gmra.mrb[42].mxu0 %v2896_v35  ;;  %1334 = vadd.xlane.f32.xlu1 %v2890_v63 }
 0x3a3   : > { %1326 = vadd.xlane.f32.xlu0 %v2882_v21  ;;  %2476 = vmatprep.mubr.f32.mxu0 %v2898_v41 }
 0x3a4   : > { %2721 = vmatpush3.bf16.msra.mxu0 %v2718_v54 }
 0x3a5   : > { %v2900_v43 = vpop.eup %2899  ;;  %2723 = vmatprep.subr.bf16.mxu0 %v2722_v8 }
 0x3a6   : > { %v2902_v44 = vpop.eup %2901  ;;  %2477 = vmatmul.mubr.f32.gmra.mrb[44].mxu0 %v2900_v43  ;;  %1340 = vadd.xlane.f32.xlu1 %v2896_v35 }
 0x3a7   : > { %1330 = vadd.xlane.f32.xlu0 %v2886_v28  ;;  %2479 = vmatprep.mubr.f32.mxu0 %v2902_v44 }
 0x3a8   : > { %2725 = vmatpush3.bf16.msra.mxu0 %v2722_v8 }
 0x3a9   : > { %v2904_v42 = vpop.eup %2903  ;;  %2727 = vmatprep.subr.bf16.mxu0 %v2726_v11 }
 0x3aa   : > { %1338 = vadd.xlane.f32.xlu1 %v2894_v40  ;;  %2480 = vmatmul.mubr.f32.gmra.mrb[46].mxu0 %v2904_v42 }
 0x3ab   : > { %1332 = vadd.xlane.f32.xlu0 %v2888_v61 }
 0x3ac   : > { %2729 = vmatpush3.bf16.msra.mxu0 %v2726_v11 }
 0x3ae   : > { %1344 = vadd.xlane.f32.xlu1 %v2900_v43 }
 0x3b2   : > { %1342 = vadd.xlane.f32.xlu1 %v2898_v41 }
 0x3b6   : > { %1346 = vadd.xlane.f32.xlu1 %v2902_v44 }
 0x3ba   : > { %1348 = vadd.xlane.f32.xlu1 %v2904_v42 }
 0x41b   : > { %v1321_v12 = vpop.xlane.xlu0 %1320 }
 0x41f   : > { %v1319_v55 = vpop.xlane.xlu0 %1318 }
 0x420   : > { %2905 = vrcp.f32 %v1319_v55 }
 0x421   : > { %2907 = vrcp.f32 %v1321_v12 }
 0x423   : > { %v1325_v56 = vpop.xlane.xlu0 %1324 }
 0x427   : > { %v1323_v14 = vpop.xlane.xlu0 %1322 }
 0x428   : > { %2909 = vrcp.f32 %v1323_v14 }
 0x429   : > { %2911 = vrcp.f32 %v1325_v56 }
 0x42a   : > { %v2906_v21 = vpop.eup %2905 }
 0x42b   : > { %v1337_v13 = vpop.xlane.xlu1 %1336  ;;  %v2908_v25 = vpop.eup %2907 }
 0x42c   : > { %v1329_v16 = vpop.xlane.xlu0 %1328 }
 0x42f   : > { %v1335_v15 = vpop.xlane.xlu1 %1334 }
 0x430   : > { %v1327_v57 = vpop.xlane.xlu0 %1326 }
 0x431   : > { %2913 = vrcp.f32 %v1327_v57 }
 0x432   : > { %2915 = vrcp.f32 %v1329_v16  ;;  %v2910_v27 = vpop.eup %2909 }
 0x433   : > { %v1341_v17 = vpop.xlane.xlu1 %1340  ;;  %v2912_v30 = vpop.eup %2911 }
 0x434   : > { %v1331_v58 = vpop.xlane.xlu0 %1330 }
 0x435   : > { %2917 = vrcp.f32 %v1331_v58 }
 0x437   : > { %v1339_v18 = vpop.xlane.xlu1 %1338 }
 0x438   : > { %v1333_v22 = vpop.xlane.xlu0 %1332 }
 0x439   : > { %2919 = vrcp.f32 %v1333_v22 }
 0x43a   : > { %2921 = vrcp.f32 %v1335_v15 }
 0x43b   : > { %v1345_v19 = vpop.xlane.xlu1 %1344  ;;  %2923 = vrcp.f32 %v1337_v13  ;;  %v2914_v24 = vpop.eup %2913 }
 0x43c   : > { %v2916_v63 = vpop.eup %2915  ;;  %2925 = vrcp.f32 %v1339_v18 }
 0x43d   : > { %2927 = vrcp.f32 %v1341_v17 }
 0x43f   : > { %v1343_v28 = vpop.xlane.xlu1 %1342  ;;  %v2918_v40 = vpop.eup %2917 }
 0x440   : > { %2929 = vrcp.f32 %v1343_v28 }
 0x441   : > { %2931 = vrcp.f32 %v1345_v19 }
 0x443   : > { %v1347_v36 = vpop.xlane.xlu1 %1346  ;;  %v2920_v41 = vpop.eup %2919 }
 0x444   : > { %v2922_v37 = vpop.eup %2921  ;;  %2933 = vrcp.f32 %v1347_v36 }
 0x445   : > { %v2924_v34 = vpop.eup %2923 }
 0x446   : > { %v2926_v50 = vpop.eup %2925 }
 0x447   : > { %v1349_v45 = vpop.xlane.xlu1 %1348  ;;  %v2928_v52 = vpop.eup %2927 }
 0x448   : > { %2935 = vrcp.f32 %v1349_v45 }
 0x44a   : > { %v2930_v3 = vpop.eup %2929 }
 0x44b   : > { %v2932_v53 = vpop.eup %2931 }
 0x44e   : > { %v2934_v7 = vpop.eup %2933 }
 0x452   : > { %v2936_v10 = vpop.eup %2935 }
 0x461   : > { %v2460_v20 = vpop.f32.mrb[32].mxu0 }
 0x462   : > { %v1416_v23 = vpop.f32.mrb[33].mxu0  ;;  %v1512_v59 = vmul.f32 %v2908_v25, %v2460_v20  ;;  %v2001_v25 = vld [vmem:[%s4190_s15] ss:$0 sm:$0xff] (!%p2000_p4) }
 0x463   : > { %v1511_v26 = vmul.f32 %v2906_v21, %v1416_v23  ;;  %1699 = vst [vmem:[%s3963_s9] sm:$0xff] (!%p2000_p4), %v2001_v25  ;;  %1700 = vst [vmem:[%s3963_s9 + $0x8] sm:$0xff] (!%p2000_p4), %v2001_v25 }
 0x464   : > { %1701 = vst [vmem:[%s3963_s9 + $0x10] sm:$0xff] (!%p2000_p4), %v2001_v25  ;;  %1702 = vst [vmem:[%s3963_s9 + $0x18] sm:$0xff] (!%p2000_p4), %v2001_v25 }
 0x465   : > { %v2463_v60 = vpop.f32.mrb[34].mxu0  ;;  %2514 = vmatprep.mubr.f32.mxu0 %v1511_v26  ;;  %1703 = vst [vmem:[%s3963_s9 + $0x20] sm:$0xff] (!%p2000_p4), %v2001_v25  ;;  %1704 = vst [vmem:[%s3963_s9 + $0x28] sm:$0xff] (!%p2000_p4), %v2001_v25 }
 0x466   : > { %v1426_v29 = vpop.f32.mrb[35].mxu0  ;;  %2515 = vmatmul.mubr.f32.vlgmr.msra.gmra.mrb[48].mxu0 %v1512_v59  ;;  %v1514_v32 = vmul.f32 %v2912_v30, %v2463_v60  ;;  %1705 = vst [vmem:[%s3963_s9 + $0x30] sm:$0xff] (!%p2000_p4), %v2001_v25  ;;  %1706 = vst [vmem:[%s3963_s9 + $0x38] sm:$0xff] (!%p2000_p4), %v2001_v25 }
 0x467   : > { %v1513_v31 = vmul.f32 %v2910_v27, %v1426_v29  ;;  %1707 = vst [vmem:[%s3963_s9 + $0x40] sm:$0xff] (!%p2000_p4), %v2001_v25  ;;  %1708 = vst [vmem:[%s3963_s9 + $0x48] sm:$0xff] (!%p2000_p4), %v2001_v25 }
 0x468   : > { %1709 = vst [vmem:[%s3963_s9 + $0x50] sm:$0xff] (!%p2000_p4), %v2001_v25  ;;  %1710 = vst [vmem:[%s3963_s9 + $0x58] sm:$0xff] (!%p2000_p4), %v2001_v25 }
 0x469   : > { %v2466_v61 = vpop.f32.mrb[36].mxu0  ;;  %2517 = vmatprep.mubr.f32.mxu0 %v1513_v31  ;;  %1711 = vst [vmem:[%s3963_s9 + $0x60] sm:$0xff] (!%p2000_p4), %v2001_v25  ;;  %1712 = vst [vmem:[%s3963_s9 + $0x68] sm:$0xff] (!%p2000_p4), %v2001_v25 }
 0x46a   : > { %v1436_v62 = vpop.f32.mrb[37].mxu0  ;;  %2518 = vmatmul.mubr.f32.gmra.mrb[50].mxu0 %v1514_v32  ;;  %v1516_v38 = vmul.f32 %v2916_v63, %v2466_v61  ;;  %1713 = vst [vmem:[%s3963_s9 + $0x70] sm:$0xff] (!%p2000_p4), %v2001_v25  ;;  %1714 = vst [vmem:[%s3963_s9 + $0x78] sm:$0xff] (!%p2000_p4), %v2001_v25 }
 0x46b   : > { %v1515_v33 = vmul.f32 %v2914_v24, %v1436_v62 }
 0x46d   : > { %v2469_v39 = vpop.f32.mrb[38].mxu0  ;;  %2520 = vmatprep.mubr.f32.mxu0 %v1515_v33 }
 0x46e   : > { %v1446_v35 = vpop.f32.mrb[39].mxu0  ;;  %2521 = vmatmul.mubr.f32.gmra.mrb[52].mxu0 %v1516_v38  ;;  %v1518_v44 = vmul.f32 %v2920_v41, %v2469_v39 }
 0x46f   : > { %v1517_v43 = vmul.f32 %v2918_v40, %v1446_v35 }
 0x471   : > { %v2472_v42 = vpop.f32.mrb[40].mxu0  ;;  %2523 = vmatprep.mubr.f32.mxu0 %v1517_v43 }
 0x472   : > { %v1456_v47 = vpop.f32.mrb[41].mxu0  ;;  %2524 = vmatmul.mubr.f32.gmra.mrb[54].mxu0 %v1518_v44  ;;  %v1520_v48 = vmul.f32 %v2924_v34, %v2472_v42 }
 0x473   : > { %v1519_v46 = vmul.f32 %v2922_v37, %v1456_v47 }
 0x475   : > { %v2475_v49 = vpop.f32.mrb[42].mxu0  ;;  %2526 = vmatprep.mubr.f32.mxu1 %v1519_v46 }
 0x476   : > { %v1466_v51 = vpop.f32.mrb[43].mxu0  ;;  %2527 = vmatmul.mubr.f32.vlgmr.msra.gmra.mrb[32].mxu1 %v1520_v48  ;;  %v1522_v1 = vmul.f32 %v2928_v52, %v2475_v49 }
 0x477   : > { %v1521_v0 = vmul.f32 %v2926_v50, %v1466_v51 }
 0x479   : > { %v2478_v2 = vpop.f32.mrb[44].mxu0  ;;  %2529 = vmatprep.mubr.f32.mxu1 %v1521_v0 }
 0x47a   : > { %v1476_v4 = vpop.f32.mrb[45].mxu0  ;;  %2530 = vmatmul.mubr.f32.gmra.mrb[34].mxu1 %v1522_v1  ;;  %v1524_v54 = vmul.f32 %v2932_v53, %v2478_v2 }
 0x47b   : > { %v1523_v5 = vmul.f32 %v2930_v3, %v1476_v4 }
 0x47d   : > { %v2481_v6 = vpop.f32.mrb[46].mxu0  ;;  %2532 = vmatprep.mubr.f32.mxu1 %v1523_v5 }
 0x47e   : > { %v1486_v8 = vpop.f32.mrb[47].mxu0  ;;  %2533 = vmatmul.mubr.f32.gmra.mrb[36].mxu1 %v1524_v54  ;;  %v1526_v11 = vmul.f32 %v2936_v10, %v2481_v6 }
 0x47f   : > { %v1525_v9 = vmul.f32 %v2934_v7, %v1486_v8 }
 0x481   : > { %2535 = vmatprep.mubr.f32.mxu1 %v1525_v9 }
 0x482   : > { %2536 = vmatmul.mubr.f32.gmra.mrb[38].mxu1 %v1526_v11 }
 0x539   : > { %v2516_v12 = vpop.f32.mrb[48].mxu0 }
 0x53a   : > { %v1609_v55 = vpop.f32.mrb[49].mxu0 }
 0x53d   : > { %v2519_v56 = vpop.f32.mrb[50].mxu0 }
 0x53e   : > { %v1619_v13 = vpop.f32.mrb[51].mxu0 }
 0x541   : > { %v2522_v14 = vpop.f32.mrb[52].mxu0 }
 0x542   : > { %v1629_v15 = vpop.f32.mrb[53].mxu0 }
 0x545   : > { %v2525_v16 = vpop.f32.mrb[54].mxu0 }
 0x546   : > { %v1639_v17 = vpop.f32.mrb[55].mxu0 }
 0x549   : > { %v2528_v57 = vpop.f32.mrb[32].mxu1 }
 0x54a   : > { %v1649_v18 = vpop.f32.mrb[33].mxu1 }
 0x54d   : > { %v2531_v58 = vpop.f32.mrb[34].mxu1 }
 0x54e   : > { %v1659_v19 = vpop.f32.mrb[35].mxu1 }
 0x550   : > { %1691 = sbr.rel (%p2000_p4) target bundleno = 1367 (0x557), region = 80 }
 0x551   : > { %v3957_v20 = vpop.f32.mrb[36].mxu1 }
 0x552   : > { %v1669_v21 = vpop.f32.mrb[37].mxu1 }
 0x555   : > { %v3959_v22 = vpop.f32.mrb[38].mxu1 }
 0x556   : > { %v1679_v23 = vpop.f32.mrb[39].mxu1 }
 0x557 PF: > { %s4191_s25 = sld [smem:[#allocation18_spill]]  ;;  %v1715_v26 = vld [vmem:[%s3963_s9] sm:$0xff]  ;;  %v1716_v59 = vld [vmem:[%s3963_s9 + $0x8] sm:$0xff]  ;;  %v1717_v60 = vld [vmem:[%s3963_s9 + $0x10] sm:$0xff]  ;;  %s1777_s18 = sshll.u32 %s3963_s9, 4  ;;  %s4018_s18 = int_to_ptr.vmem [resolvable:$true] %s1777_s18 }
 0x558   : > { %v1731_v27 = vadd.f32 %v1715_v26, %v1609_v55  ;;  %v1732_v28 = vadd.f32 %v2516_v12, %v1716_v59  ;;  %v1733_v29 = vadd.f32 %v1717_v60, %v1619_v13  ;;  %v1718_v30 = vld [vmem:[%s3963_s9 + $0x18] sm:$0xff]  ;;  %v1719_v31 = vld [vmem:[%s3963_s9 + $0x20] sm:$0xff]  ;;  %v1720_v32 = vld [vmem:[%s3963_s9 + $0x28] sm:$0xff]  ;;  %s4192_s20 = sld [smem:[#allocation28_spill]]  ;;  %s4193_s23 = sld [smem:[#allocation36_spill]] }
 0x559   : > { %v1734_v61 = vadd.f32 %v2519_v56, %v1718_v30  ;;  %v1735_v24 = vadd.f32 %v1719_v31, %v1629_v15  ;;  %v1736_v62 = vadd.f32 %v2522_v14, %v1720_v32  ;;  %v1721_v63 = vld [vmem:[%s3963_s9 + $0x30] sm:$0xff]  ;;  %v1722_v33 = vld [vmem:[%s3963_s9 + $0x38] sm:$0xff]  ;;  %v1723_v36 = vld [vmem:[%s3963_s9 + $0x40] sm:$0xff]  ;;  %s1764_s27 = scalar_lea.sflag [#allocation4], %s3639_s1  ;;  %s3087_s29 = scalar_lea.vmem %s4018_s18, 2048 }
 0x55a   : > { %1747 = vst [vmem:[%s3963_s9] sm:$0xff] %v1731_v27  ;;  %1748 = vst [vmem:[%s3963_s9 + $0x8] sm:$0xff] %v1732_v28  ;;  %v1737_v38 = vadd.f32 %v1721_v63, %v1639_v17  ;;  %v1738_v39 = vadd.f32 %v2525_v16, %v1722_v33  ;;  %v1739_v40 = vadd.f32 %v1723_v36, %v1649_v18  ;;  %v1724_v35 = vld [vmem:[%s3963_s9 + $0x48] sm:$0xff]  ;;  %v1725_v41 = vld [vmem:[%s3963_s9 + $0x50] sm:$0xff]  ;;  %p3088_p13 = scmp.ne.s32.totalorder %s4018_s18, %s3087_s29  ;;  %s3227_s21 = smov [#allocation11]  }
 0x55b   : > { %1749 = vst [vmem:[%s3963_s9 + $0x10] sm:$0xff] %v1733_v29  ;;  %v1726_v43 = vld [vmem:[%s3963_s9 + $0x58] sm:$0xff]  ;;  %1750 = vst [vmem:[%s3963_s9 + $0x18] sm:$0xff] %v1734_v61  ;;  %v1740_v44 = vadd.f32 %v2528_v57, %v1724_v35  ;;  %v1741_v42 = vadd.f32 %v1725_v41, %v1659_v19  ;;  %v1727_v45 = vld [vmem:[%s3963_s9 + $0x60] sm:$0xff]  ;;  %s3091_s26 = sshll.u32 %s3227_s21, 4  ;;  %s3092_s26 = int_to_ptr.vmem [resolvable:$false] %s3091_s26 }
 0x55c   : > { %1751 = vst [vmem:[%s3963_s9 + $0x20] sm:$0xff] %v1735_v24  ;;  %1752 = vst [vmem:[%s3963_s9 + $0x28] sm:$0xff] %v1736_v62  ;;  %v1742_v37 = vadd.f32 %v2531_v58, %v1726_v43  ;;  %v1728_v47 = vld [vmem:[%s3963_s9 + $0x68] sm:$0xff]  ;;  %v1729_v34 = vld [vmem:[%s3963_s9 + $0x70] sm:$0xff]  ;;  %v1743_v46 = vadd.f32 %v1727_v45, %v1669_v21  ;;  %s3093_s7 = scalar_lea.vmem %s3092_s26, 4096  ;;  %p3094_p8 = scmp.lt.s32.totalorder %s4018_s18, %s3092_s26 }
 0x55d   : > { %s2009_s17 = sshll.u32 %s4191_s25, 11  ;;  %1753 = vst [vmem:[%s3963_s9 + $0x30] sm:$0xff] %v1737_v38  ;;  %1754 = vst [vmem:[%s3963_s9 + $0x38] sm:$0xff] %v1738_v39  ;;  %v1744_v48 = vadd.f32 %v3957_v20, %v1728_v47  ;;  %v1745_v49 = vadd.f32 %v1729_v34, %v1679_v23  ;;  %v1730_v50 = vld [vmem:[%s3963_s9 + $0x78] sm:$0xff]  ;;  %p3095_p10 = scmp.lt.s32.totalorder %s3093_s7, %s3087_s29 }
 0x55e   : > { %1755 = vst [vmem:[%s3963_s9 + $0x40] sm:$0xff] %v1739_v40  ;;  %s4016_s8 = scalar_lea.hbm %s4193_s23, %s2009_s17  ;;  %1756 = vst [vmem:[%s3963_s9 + $0x48] sm:$0xff] %v1740_v44  ;;  %v1746_v51 = vadd.f32 %v3959_v22, %v1730_v50  ;;  %p4194_p0 = scmp.ne.s32.totalorder %s4192_s20, 0 }
 0x55f   : > { %1757 = vst [vmem:[%s3963_s9 + $0x50] sm:$0xff] %v1741_v42  ;;  %1758 = vst [vmem:[%s3963_s9 + $0x58] sm:$0xff] %v1742_v37  ;;  %p3096_p1 = por %p3095_p10, %p3094_p8 }
 0x560   : > { %1759 = vst [vmem:[%s3963_s9 + $0x60] sm:$0xff] %v1743_v46  ;;  %1760 = vst [vmem:[%s3963_s9 + $0x68] sm:$0xff] %v1744_v48  ;;  %p3089_p3 = pnand %p3088_p13, %p4194_p0 }
 0x561   : > { %1761 = vst [vmem:[%s3963_s9 + $0x70] sm:$0xff] %v1745_v49  ;;  %1762 = vst [vmem:[%s3963_s9 + $0x78] sm:$0xff] %v1746_v51 }
 0x562   : > { %p3090_p5 = pneg %p3089_p3 }
 0x564   : > { %p3097_p2 = pnand %p3096_p1, %p3090_p5 }
 0x566   : > { %3100 = shalt.err (!%p3097_p2)
}
 0x567   : > { %s3101_s22 = scalar_lea.hbm %s4016_s8, 2048  ;;  %s3105_s24 = scalar_lea.hbm %s4193_s23, 4096 }
 0x568   : > { %p3102_p7 = scmp.ne.s32.totalorder %s4016_s8, %s3101_s22  ;;  %p3106_p6 = scmp.lt.u32.totalorder %s4016_s8, %s4193_s23 }
 0x569   : > { %p3107_p12 = scmp.lt.u32.totalorder %s3105_s24, %s3101_s22  ;;  %p3109_p13 = scmp.lt.u32.totalorder %s3101_s22, %s4016_s8 }
 0x56a   : > { %p3103_p9 = pnand %p3102_p7, %p4194_p0 }
 0x56b   : > { %p3108_p4 = por %p3107_p12, %p3106_p6 }
 0x56c   : > { %p3104_p11 = pneg %p3103_p9 }
 0x56d   : > { %p3110_p3 = por %p3109_p13, %p3108_p4 }
 0x56f   : > { %p3111_p5 = pnand %p3110_p3, %p3104_p11 }
 0x571   : > { %3114 = shalt.err (!%p3111_p5)
}
 0x572   : > { %s3228_s25 = smov 128   ;;  %s3229_s17 = smov 8  }
 0x573   : > { %2756 = dma.vmem_to_hbm [thread:$0]  (%p4194_p0), %s4018_s18, 2048, %s4016_s8, %s1764_s27, %s3228_s25, %s3228_s25, %s3229_s17  }
 0x574 PF: > { %p2779_p8 = scmp.ge.s32.totalorder %s3217_s19, 2  ;;  %s1792_s2 = sand.u32 1, %s3189_s12  }
 0x575   : > { %p4195_p10 = scmp.ne.s32.totalorder %s4171_s10, 0  ;;  %s1793_s5 = scalar_lea.sflag [#allocation4], %s1792_s2 }
 0x577   : > { %p2775_p1 = pnand %p2779_p8, %p4195_p10 }
 0x579   : > { %3172 = dma.done.wait (!%p2775_p1), %s1793_s5, 2048  }
 0x57a   : > { %3174 = vsyncadd (!%p2775_p1), %s1793_s5, 4294965248  ;;  %s31_s19 = sadd.s32 1, %s3217_s19   ;;  %s4196_s30 = sld [smem:[#allocation16_spill]] }
 0x57b   : > { %p28_p2 = scmp.ge.s32.totalorder %s31_s19, 6   ;;  %s4197_s15 = sld [smem:[#allocation19_spill]] }
 0x57c   : > { %s4198_s16 = sld [smem:[#allocation20_spill]]  ;;  %s4199_s17 = sld [smem:[#allocation24_spill]] }
 0x57d   : > { %s4200_s18 = sld [smem:[#allocation25_spill]]  ;;  %s4201_s10 = smov %s3185_s11 }
 0x57e   : > { %s4202_s11 = smov %s3508_s28  ;;  %s4203_s12 = smov %s3193_s13 }
 0x57f   : > { %s4204_s13 = smov %s3197_s14  ;;  %s4205_s14 = smov %s3511_s6 }
 0x580   :  { %30 = sbr.rel (!%p28_p2) target bundleno = 22 (0x16), region = 162 }
 0x587   :  { %1798 = vsyncpa [#allocation3], 1 }
 0x588   :  { %1800 = vsyncpa [#allocation3 + $0x1], 1 }
 0x589   :  { %1801 = vsyncpa [#allocation6], 1 }
 0x58a   :  { %1803 = vsyncpa [#allocation6 + $0x1], 1 }
 0x58b   :  { %1804 = vsyncpa [#allocation9], 1 }
 0x58c   :  { %1806 = vsyncpa [#allocation9 + $0x1], 1 }
 0x58d   :  { %1807 = vsyncpa [#allocation4], 1 }
 0x58e   :  { %1809 = vsyncpa [#allocation4 + $0x1], 1 }

</bundles_post_ra>
